<compile_context>
chip_gen: v7x
topology: tpu7x:2x2x1
jax: 0.10.0
libtpu: 0.0.40
codegen_flags: <defaults>
</compile_context>

<pallas_src>
import functools

import jax
import jax.numpy as jnp
from jax.experimental import pallas as pl
from jax.experimental.pallas import tpu as pltpu

LANE = 128    # vreg lane width  -> feature dims / node dim padded to this
SUBLANE = 8   # f32 sublane granule -> graph count padded to this


# ----------------------------------------------------------------------------- helpers

def _round_up(n, m):
    return ((n + m - 1) // m) * m


def _pad2(a, rows, cols):
    r, c = a.shape
    return jnp.pad(a, ((0, rows - r), (0, cols - c)))


def _vmem_limit_bytes():
    """Generation-aware VMEM budget: ~85% of physical VMEM (v7x 64 MiB ->
    ~54 MiB, v5e/v6e 128 MiB -> ~108 MiB), never below the 32 MiB default."""
    try:
        cap = int(getattr(pltpu.get_tpu_info(), "vmem_capacity_bytes",
                          64 * 1024 * 1024))
    except Exception:
        cap = 64 * 1024 * 1024
    return max(32 * 1024 * 1024, int(cap * 0.85))


# ----------------------------------------------------------------------------- fused kernel

def _gin_fused_kernel(x_ref, adj_ref, pool_ref,
                      w_pre_ref, b_pre_ref,
                      w1_ref, b1_ref, w2_ref, b2_ref,
                      w_post_ref, b_post_ref,
                      w_ro_ref, b_ro_ref,
                      o_ref, *, nlayer, nclass):
    """Entire GIN forward in one invocation. h is carried as a loop value
    (no VMEM scratch); adjacency stays resident in VMEM across all layers."""
    # pre: h = x @ W_pre + b_pre
    h = (jnp.dot(x_ref[...], w_pre_ref[...],
                 preferred_element_type=jnp.float32)
         + b_pre_ref[...])

    # GINConv layers (eps = 0):  h <- ReLU( MLP( (A + I) @ h ) )
    # Static unroll; weights indexed with static Python ints -> free slices.
    for i in range(nlayer):
        # (A+I) is stored bf16 (exact for small-integer edge counts). h stays
        # f32 so this dot promotes to f32 and matches the torch reference
        # exactly; for large graphs, use `h.astype(jnp.bfloat16)` here for the
        # native-rate bf16 MXU path (quantizes h to ~3 significant digits).
        agg = jnp.dot(adj_ref[...], h, preferred_element_type=jnp.float32)
        t = jnp.dot(agg, w1_ref[i], preferred_element_type=jnp.float32) + b1_ref[i]
        t = jnp.maximum(t, 0.0)
        h = jnp.dot(t, w2_ref[i], preferred_element_type=jnp.float32) + b2_ref[i]
        h = jnp.maximum(h, 0.0)
        # dropout (eval mode) is identity.

    # global_add_pool: hg = P @ h  (P is the bf16 one-hot membership matrix)
    hg = jnp.dot(pool_ref[...], h, preferred_element_type=jnp.float32)

    # post: Linear + ReLU (dropout eval = identity)
    hg = jnp.dot(hg, w_post_ref[...], preferred_element_type=jnp.float32) + b_post_ref[...]
    hg = jnp.maximum(hg, 0.0)

    # readout + log_softmax over the real (unpadded) class columns
    logits = jnp.dot(hg, w_ro_ref[...], preferred_element_type=jnp.float32) + b_ro_ref[...]
    col = jax.lax.broadcasted_iota(jnp.int32, logits.shape, 1)
    logits = jnp.where(col < nclass, logits, jnp.float32(-1e30))
    m = jnp.max(logits, axis=-1, keepdims=True)
    z = logits - m
    lse = jnp.log(jnp.sum(jnp.exp(z), axis=-1, keepdims=True))
    o_ref[...] = (z - lse).astype(o_ref.dtype)


# ----------------------------------------------------------------------------- wrapper

@jax.jit
def gin_forward(x, adj, pool_mat, params):
    N, nfeat = x.shape
    G = pool_mat.shape[0]
    nhid = params["pre"][0].shape[1]
    nclass = params["readout"][0].shape[1]
    nlayer = len(params["convs"])

    # Node count is the LANE (last) dim of adj / pool -> pad to 128 so every
    # operand and every store is lane-dense; graph count is sublane-only.
    n_pad = _round_up(N, LANE)
    g_pad = _round_up(G, SUBLANE)
    f_pad = _round_up(nfeat, LANE)
    h_pad = _round_up(nhid, LANE)
    c_pad = _round_up(nclass, LANE)

    # eps = 0  ->  (1+eps)h + A@h == (A+I)@h : fold the self loop into A
    # BEFORE padding, so padded rows/cols stay exactly zero (padding invariant:
    # real rows never read padded-node garbage).
    adj_si = adj + jnp.eye(N, dtype=adj.dtype)

    x_p = _pad2(x, n_pad, f_pad)                                   # f32 (exactness)
    adj_p = _pad2(adj_si, n_pad, n_pad).astype(jnp.bfloat16)       # exact for counts <= 256
    pool_p = _pad2(pool_mat, g_pad, n_pad).astype(jnp.bfloat16)    # one-hot: exact

    # Zero-padded weight columns / bias entries keep the valid region exact.
    w_pre = _pad2(params["pre"][0], f_pad, h_pad)
    b_pre = _pad2(params["pre"][1], 1, h_pad)
    w1s = jnp.stack([_pad2(w1, h_pad, h_pad) for (w1, _, _, _) in params["convs"]])
    b1s = jnp.stack([_pad2(b1, 1, h_pad) for (_, b1, _, _) in params["convs"]])
    w2s = jnp.stack([_pad2(w2, h_pad, h_pad) for (_, _, w2, _) in params["convs"]])
    b2s = jnp.stack([_pad2(b2, 1, h_pad) for (_, _, _, b2) in params["convs"]])
    w_post = _pad2(params["post"][0], h_pad, h_pad)
    b_post = _pad2(params["post"][1], 1, h_pad)
    w_ro = _pad2(params["readout"][0], h_pad, c_pad)
    b_ro = _pad2(params["readout"][1], 1, c_pad)

    args = (x_p, adj_p, pool_p, w_pre, b_pre, w1s, b1s, w2s, b2s,
            w_post, b_post, w_ro, b_ro)

    # Advisory cost estimate for XLA's surrounding-op scheduler.
    flops = 2 * (n_pad * f_pad * h_pad
                 + nlayer * (n_pad * n_pad * h_pad + 2 * n_pad * h_pad * h_pad)
                 + g_pad * n_pad * h_pad
                 + g_pad * h_pad * h_pad
                 + g_pad * h_pad * c_pad)
    bytes_accessed = int(sum(int(a.size) * a.dtype.itemsize for a in args)
                         + g_pad * c_pad * 4)
    cost = pl.CostEstimate(flops=int(flops),
                           transcendentals=int(g_pad * c_pad),
                           bytes_accessed=bytes_accessed)

    kernel = functools.partial(_gin_fused_kernel, nlayer=nlayer, nclass=nclass)
    vspec = pl.BlockSpec(memory_space=pltpu.MemorySpace.VMEM)

    # Gridless, fully-fused call: the whole graph fits VMEM at these shapes.
    # (Large-graph tiled/pipelined grid left as TODO at top of file.)
    out_p = pl.pallas_call(
        kernel,
        out_shape=jax.ShapeDtypeStruct((g_pad, c_pad), jnp.float32),
        in_specs=[vspec] * len(args),
        out_specs=vspec,
        cost_estimate=cost,
        compiler_params=pltpu.CompilerParams(
            vmem_limit_bytes=_vmem_limit_bytes()),
    )(*args)

    return out_p[:G, :nclass]


# ----------------------------------------------------------------------------- params / reference

def init_params(key, nfeat, nhid, nclass, nlayer):
    """Deterministic synthetic parameter init (shapes match torch.nn.Linear,
    stored as (in_features, out_features) so y = x @ W + b)."""
    def lin(k, fan_in, fan_out):
        kw, kb = jax.random.split(k)
        bound = 1.0 / jnp.sqrt(fan_in)
        w = jax.random.uniform(kw, (fan_in, fan_out), jnp.float32, -bound, bound)
        b = jax.random.uniform(kb, (1, fan_out), jnp.float32, -bound, bound)
        return w, b

    keys = jax.random.split(key, 3 + 2 * nlayer)
    params = {}
    params["pre"] = lin(keys[0], nfeat, nhid)
    convs = []
    for i in range(nlayer):
        w1, b1 = lin(keys[1 + 2 * i], nhid, nhid)
        w2, b2 = lin(keys[2 + 2 * i], nhid, nhid)
        convs.append((w1, b1, w2, b2))
    params["convs"] = convs
    params["post"] = lin(keys[1 + 2 * nlayer], nhid, nhid)
    params["readout"] = lin(keys[2 + 2 * nlayer], nhid, nclass)
    return params


def reference_forward(x, adj, pool_mat, params):
    """Plain-JAX reference (matches the PyTorch module in eval mode)."""
    h = x @ params["pre"][0] + params["pre"][1]
    for (w1, b1, w2, b2) in params["convs"]:
        agg = adj @ h + h
        t = jnp.maximum(agg @ w1 + b1, 0.0)
        h = jnp.maximum(t @ w2 + b2, 0.0)
    hg = pool_mat @ h
    hg = jnp.maximum(hg @ params["post"][0] + params["post"][1], 0.0)
    logits = hg @ params["readout"][0] + params["readout"][1]
    return jax.nn.log_softmax(logits, axis=1)


# ----------------------------------------------------------------------------- main

if __name__ == "__main__":
    nfeat, nhid, nclass, nlayer = 16, 32, 8, 2
    num_nodes, num_graphs = 16, 2

    key = jax.random.PRNGKey(0)
    k_x, k_p = jax.random.split(key)

    # node features
    x = jax.random.normal(k_x, (num_nodes, nfeat), dtype=jnp.float32)

    # batch assignment: first 8 nodes -> graph 0, last 8 -> graph 1
    batch = jnp.concatenate([jnp.zeros(8, jnp.int32), jnp.ones(8, jnp.int32)])

    # edge_index: bidirectional ring within each graph (PyG convention: [src, dst])
    src_list, dst_list = [], []
    for g, base in enumerate([0, 8]):
        n = 8
        for i in range(n):
            a, b = base + i, base + (i + 1) % n
            src_list += [a, b]
            dst_list += [b, a]
    src = jnp.array(src_list, jnp.int32)
    dst = jnp.array(dst_list, jnp.int32)

    # dense adjacency: A[dst, src] += 1  (GINConv sums source features at targets)
    adj = jnp.zeros((num_nodes, num_nodes), jnp.float32).at[dst, src].add(1.0)

    # bf16 storage of (A + I) is exact only for integer entries <= 256.
    assert float(jnp.max(adj)) + 1.0 <= 256.0, "edge counts too large for bf16 adjacency"

    # pooling one-hot: P[g, n] = 1 if node n belongs to graph g
    pool_mat = (batch[None, :] == jnp.arange(num_graphs)[:, None]).astype(jnp.float32)

    params = init_params(k_p, nfeat, nhid, nclass, nlayer)

    out = gin_forward(x, adj, pool_mat, params)
    out = jax.block_until_ready(out)

    ref = reference_forward(x, adj, pool_mat, params)
    assert out.shape == (num_graphs, nclass), out.shape
    assert jnp.allclose(out, ref, atol=1e-4, rtol=1e-4), (
        "mismatch vs reference: max abs err = %e" % float(jnp.max(jnp.abs(out - ref)))
    )

    print("KERNEL_OK")
</pallas_src>

<mosaic_0001>
module attributes {stable_mosaic.version = 11 : i64} {
  func.func @_gin_fused_kernel(%arg0: memref<128x128xf32, #tpu.memory_space<vmem>>, %arg1: memref<128x128xbf16, #tpu.memory_space<vmem>>, %arg2: memref<8x128xbf16, #tpu.memory_space<vmem>>, %arg3: memref<128x128xf32, #tpu.memory_space<vmem>>, %arg4: memref<1x128xf32, #tpu.memory_space<vmem>>, %arg5: memref<2x128x128xf32, #tpu.memory_space<vmem>>, %arg6: memref<2x1x128xf32, #tpu.memory_space<vmem>>, %arg7: memref<2x128x128xf32, #tpu.memory_space<vmem>>, %arg8: memref<2x1x128xf32, #tpu.memory_space<vmem>>, %arg9: memref<128x128xf32, #tpu.memory_space<vmem>>, %arg10: memref<1x128xf32, #tpu.memory_space<vmem>>, %arg11: memref<128x128xf32, #tpu.memory_space<vmem>>, %arg12: memref<1x128xf32, #tpu.memory_space<vmem>>, %arg13: memref<8x128xf32, #tpu.memory_space<vmem>>) attributes {dimension_semantics = [], scalar_prefetch = 0 : i64, scratch_operands = 0 : i64, tpu.core_type = #tpu.core_type<tc>} {
    %c0 = arith.constant 0 : index
    %c0_0 = arith.constant 0 : index
    %0 = vector.load %arg0[%c0, %c0_0] : memref<128x128xf32, #tpu.memory_space<vmem>>, vector<128x128xf32>
    %c0_1 = arith.constant 0 : index
    %c0_2 = arith.constant 0 : index
    %1 = vector.load %arg3[%c0_1, %c0_2] : memref<128x128xf32, #tpu.memory_space<vmem>>, vector<128x128xf32>
    %cst = arith.constant dense<0.000000e+00> : vector<128x128xf32>
    %2 = tpu.matmul %0, %1, %cst {dimension_numbers = #tpu.dot_dimension_numbers<[1], [0], [0], [1], [0, 0, 1, 1], [], []>} : vector<128x128xf32>, vector<128x128xf32>, vector<128x128xf32> -> vector<128x128xf32>
    %c0_3 = arith.constant 0 : index
    %c0_4 = arith.constant 0 : index
    %3 = vector.load %arg4[%c0_3, %c0_4] : memref<1x128xf32, #tpu.memory_space<vmem>>, vector<1x128xf32>
    %4 = vector.broadcast %3 : vector<1x128xf32> to vector<128x128xf32>
    %5 = arith.addf %2, %4 : vector<128x128xf32>
    %c0_5 = arith.constant 0 : index
    %c0_6 = arith.constant 0 : index
    %6 = vector.load %arg1[%c0_5, %c0_6] : memref<128x128xbf16, #tpu.memory_space<vmem>>, vector<128x128xbf16>
    %cst_7 = arith.constant dense<0.000000e+00> : vector<128x128xf32>
    %7 = tpu.matmul %6, %5, %cst_7 {dimension_numbers = #tpu.dot_dimension_numbers<[1], [0], [0], [1], [0, 0, 1, 1], [], []>} : vector<128x128xbf16>, vector<128x128xf32>, vector<128x128xf32> -> vector<128x128xf32>
    %c0_8 = arith.constant 0 : index
    %c0_9 = arith.constant 0 : index
    %c0_10 = arith.constant 0 : index
    %8 = vector.load %arg5[%c0_8, %c0_9, %c0_10] : memref<2x128x128xf32, #tpu.memory_space<vmem>>, vector<1x128x128xf32>
    %9 = vector.shape_cast %8 : vector<1x128x128xf32> to vector<128x128xf32>
    %cst_11 = arith.constant dense<0.000000e+00> : vector<128x128xf32>
    %10 = tpu.matmul %7, %9, %cst_11 {dimension_numbers = #tpu.dot_dimension_numbers<[1], [0], [0], [1], [0, 0, 1, 1], [], []>} : vector<128x128xf32>, vector<128x128xf32>, vector<128x128xf32> -> vector<128x128xf32>
    %c0_12 = arith.constant 0 : index
    %c0_13 = arith.constant 0 : index
    %c0_14 = arith.constant 0 : index
    %11 = vector.load %arg6[%c0_12, %c0_13, %c0_14] : memref<2x1x128xf32, #tpu.memory_space<vmem>>, vector<1x1x128xf32>
    %12 = vector.shape_cast %11 : vector<1x1x128xf32> to vector<1x128xf32>
    %13 = vector.broadcast %12 : vector<1x128xf32> to vector<128x128xf32>
    %14 = arith.addf %10, %13 : vector<128x128xf32>
    %cst_15 = arith.constant 0.000000e+00 : f32
    %15 = vector.broadcast %cst_15 : f32 to vector<128x128xf32>
    %16 = arith.maximumf %14, %15 : vector<128x128xf32>
    %c0_16 = arith.constant 0 : index
    %c0_17 = arith.constant 0 : index
    %c0_18 = arith.constant 0 : index
    %17 = vector.load %arg7[%c0_16, %c0_17, %c0_18] : memref<2x128x128xf32, #tpu.memory_space<vmem>>, vector<1x128x128xf32>
    %18 = vector.shape_cast %17 : vector<1x128x128xf32> to vector<128x128xf32>
    %cst_19 = arith.constant dense<0.000000e+00> : vector<128x128xf32>
    %19 = tpu.matmul %16, %18, %cst_19 {dimension_numbers = #tpu.dot_dimension_numbers<[1], [0], [0], [1], [0, 0, 1, 1], [], []>} : vector<128x128xf32>, vector<128x128xf32>, vector<128x128xf32> -> vector<128x128xf32>
    %c0_20 = arith.constant 0 : index
    %c0_21 = arith.constant 0 : index
    %c0_22 = arith.constant 0 : index
    %20 = vector.load %arg8[%c0_20, %c0_21, %c0_22] : memref<2x1x128xf32, #tpu.memory_space<vmem>>, vector<1x1x128xf32>
    %21 = vector.shape_cast %20 : vector<1x1x128xf32> to vector<1x128xf32>
    %22 = vector.broadcast %21 : vector<1x128xf32> to vector<128x128xf32>
    %23 = arith.addf %19, %22 : vector<128x128xf32>
    %cst_23 = arith.constant 0.000000e+00 : f32
    %24 = vector.broadcast %cst_23 : f32 to vector<128x128xf32>
    %25 = arith.maximumf %23, %24 : vector<128x128xf32>
    %c0_24 = arith.constant 0 : index
    %c0_25 = arith.constant 0 : index
    %26 = vector.load %arg1[%c0_24, %c0_25] : memref<128x128xbf16, #tpu.memory_space<vmem>>, vector<128x128xbf16>
    %cst_26 = arith.constant dense<0.000000e+00> : vector<128x128xf32>
    %27 = tpu.matmul %26, %25, %cst_26 {dimension_numbers = #tpu.dot_dimension_numbers<[1], [0], [0], [1], [0, 0, 1, 1], [], []>} : vector<128x128xbf16>, vector<128x128xf32>, vector<128x128xf32> -> vector<128x128xf32>
    %c1 = arith.constant 1 : index
    %c0_27 = arith.constant 0 : index
    %c0_28 = arith.constant 0 : index
    %28 = vector.load %arg5[%c1, %c0_27, %c0_28] : memref<2x128x128xf32, #tpu.memory_space<vmem>>, vector<1x128x128xf32>
    %29 = vector.shape_cast %28 : vector<1x128x128xf32> to vector<128x128xf32>
    %cst_29 = arith.constant dense<0.000000e+00> : vector<128x128xf32>
    %30 = tpu.matmul %27, %29, %cst_29 {dimension_numbers = #tpu.dot_dimension_numbers<[1], [0], [0], [1], [0, 0, 1, 1], [], []>} : vector<128x128xf32>, vector<128x128xf32>, vector<128x128xf32> -> vector<128x128xf32>
    %c1_30 = arith.constant 1 : index
    %c0_31 = arith.constant 0 : index
    %c0_32 = arith.constant 0 : index
    %31 = vector.load %arg6[%c1_30, %c0_31, %c0_32] : memref<2x1x128xf32, #tpu.memory_space<vmem>>, vector<1x1x128xf32>
    %32 = vector.shape_cast %31 : vector<1x1x128xf32> to vector<1x128xf32>
    %33 = vector.broadcast %32 : vector<1x128xf32> to vector<128x128xf32>
    %34 = arith.addf %30, %33 : vector<128x128xf32>
    %cst_33 = arith.constant 0.000000e+00 : f32
    %35 = vector.broadcast %cst_33 : f32 to vector<128x128xf32>
    %36 = arith.maximumf %34, %35 : vector<128x128xf32>
    %c1_34 = arith.constant 1 : index
    %c0_35 = arith.constant 0 : index
    %c0_36 = arith.constant 0 : index
    %37 = vector.load %arg7[%c1_34, %c0_35, %c0_36] : memref<2x128x128xf32, #tpu.memory_space<vmem>>, vector<1x128x128xf32>
    %38 = vector.shape_cast %37 : vector<1x128x128xf32> to vector<128x128xf32>
    %cst_37 = arith.constant dense<0.000000e+00> : vector<128x128xf32>
    %39 = tpu.matmul %36, %38, %cst_37 {dimension_numbers = #tpu.dot_dimension_numbers<[1], [0], [0], [1], [0, 0, 1, 1], [], []>} : vector<128x128xf32>, vector<128x128xf32>, vector<128x128xf32> -> vector<128x128xf32>
    %c1_38 = arith.constant 1 : index
    %c0_39 = arith.constant 0 : index
    %c0_40 = arith.constant 0 : index
    %40 = vector.load %arg8[%c1_38, %c0_39, %c0_40] : memref<2x1x128xf32, #tpu.memory_space<vmem>>, vector<1x1x128xf32>
    %41 = vector.shape_cast %40 : vector<1x1x128xf32> to vector<1x128xf32>
    %42 = vector.broadcast %41 : vector<1x128xf32> to vector<128x128xf32>
    %43 = arith.addf %39, %42 : vector<128x128xf32>
    %cst_41 = arith.constant 0.000000e+00 : f32
    %44 = vector.broadcast %cst_41 : f32 to vector<128x128xf32>
    %45 = arith.maximumf %43, %44 : vector<128x128xf32>
    %c0_42 = arith.constant 0 : index
    %c0_43 = arith.constant 0 : index
    %46 = vector.load %arg2[%c0_42, %c0_43] : memref<8x128xbf16, #tpu.memory_space<vmem>>, vector<8x128xbf16>
    %cst_44 = arith.constant dense<0.000000e+00> : vector<8x128xf32>
    %47 = tpu.matmul %46, %45, %cst_44 {dimension_numbers = #tpu.dot_dimension_numbers<[1], [0], [0], [1], [0, 0, 1, 1], [], []>} : vector<8x128xbf16>, vector<128x128xf32>, vector<8x128xf32> -> vector<8x128xf32>
    %c0_45 = arith.constant 0 : index
    %c0_46 = arith.constant 0 : index
    %48 = vector.load %arg9[%c0_45, %c0_46] : memref<128x128xf32, #tpu.memory_space<vmem>>, vector<128x128xf32>
    %cst_47 = arith.constant dense<0.000000e+00> : vector<8x128xf32>
    %49 = tpu.matmul %47, %48, %cst_47 {dimension_numbers = #tpu.dot_dimension_numbers<[1], [0], [0], [1], [0, 0, 1, 1], [], []>} : vector<8x128xf32>, vector<128x128xf32>, vector<8x128xf32> -> vector<8x128xf32>
    %c0_48 = arith.constant 0 : index
    %c0_49 = arith.constant 0 : index
    %50 = vector.load %arg10[%c0_48, %c0_49] : memref<1x128xf32, #tpu.memory_space<vmem>>, vector<1x128xf32>
    %51 = vector.broadcast %50 : vector<1x128xf32> to vector<8x128xf32>
    %52 = arith.addf %49, %51 : vector<8x128xf32>
    %cst_50 = arith.constant 0.000000e+00 : f32
    %53 = vector.broadcast %cst_50 : f32 to vector<8x128xf32>
    %54 = arith.maximumf %52, %53 : vector<8x128xf32>
    %c0_51 = arith.constant 0 : index
    %c0_52 = arith.constant 0 : index
    %55 = vector.load %arg11[%c0_51, %c0_52] : memref<128x128xf32, #tpu.memory_space<vmem>>, vector<128x128xf32>
    %cst_53 = arith.constant dense<0.000000e+00> : vector<8x128xf32>
    %56 = tpu.matmul %54, %55, %cst_53 {dimension_numbers = #tpu.dot_dimension_numbers<[1], [0], [0], [1], [0, 0, 1, 1], [], []>} : vector<8x128xf32>, vector<128x128xf32>, vector<8x128xf32> -> vector<8x128xf32>
    %c0_54 = arith.constant 0 : index
    %c0_55 = arith.constant 0 : index
    %57 = vector.load %arg12[%c0_54, %c0_55] : memref<1x128xf32, #tpu.memory_space<vmem>>, vector<1x128xf32>
    %58 = vector.broadcast %57 : vector<1x128xf32> to vector<8x128xf32>
    %59 = arith.addf %56, %58 : vector<8x128xf32>
    %60 = tpu.iota {dimensions = array<i32: 1>} : vector<8x128xi32>
    %c8_i32 = arith.constant 8 : i32
    %61 = vector.broadcast %c8_i32 : i32 to vector<8x128xi32>
    %62 = arith.cmpi slt, %60, %61 : vector<8x128xi32>
    %cst_56 = arith.constant -1.000000e+30 : f32
    %63 = vector.broadcast %cst_56 : f32 to vector<8x128xf32>
    %64 = arith.select %62, %59, %63 : vector<8x128xi1>, vector<8x128xf32>
    %cst_57 = arith.constant dense<0xFF800000> : vector<8xf32>
    %65 = vector.multi_reduction <maximumf>, %64, %cst_57 [1] : vector<8x128xf32> to vector<8xf32>
    %66 = vector.shape_cast %65 : vector<8xf32> to vector<8x1xf32>
    %67 = vector.broadcast %66 : vector<8x1xf32> to vector<8x128xf32>
    %68 = arith.subf %64, %67 : vector<8x128xf32>
    %69 = math.exp %68 : vector<8x128xf32>
    %cst_58 = arith.constant dense<0.000000e+00> : vector<8xf32>
    %70 = vector.multi_reduction <add>, %69, %cst_58 [1] : vector<8x128xf32> to vector<8xf32>
    %71 = vector.shape_cast %70 : vector<8xf32> to vector<8x1xf32>
    %72 = math.log %71 : vector<8x1xf32>
    %73 = vector.broadcast %72 : vector<8x1xf32> to vector<8x128xf32>
    %74 = arith.subf %68, %73 : vector<8x128xf32>
    %c0_59 = arith.constant 0 : index
    %c0_60 = arith.constant 0 : index
    %75 = vector.load %arg13[%c0_59, %c0_60] : memref<8x128xf32, #tpu.memory_space<vmem>>, vector<8x128xf32>
    tpu.vector_store %arg13[%c0_59, %c0_60], %74 {strides = array<i32>} : memref<8x128xf32, #tpu.memory_space<vmem>>, vector<8x128xf32>,
    return
  }
}

</mosaic_0001>

<bundles_post_ra>
// kernel: gin_forward.1
= control target key start
LH: loop header
LB: loop body
LE: loop exit
PB: predicated region body
PF: predicated region fallthrough
CT: control target
= control target key end

     0   :  { %vm2672_vm0 = vmmov 0   ;;  %s3277_s3 = inlined_call_operand.vmem [shape: f32[128,128], index: 3, kind: input, shape index: {}]   ;;  %s3278_s0 = inlined_call_operand.vmem [shape: f32[128,128], index: 0, kind: input, shape index: {}]   ;;  %s3279_s1 = inlined_call_operand.vmem [shape: bf16[128,128], index: 1, kind: input, shape index: {}]   ;;  %s3280_s5 = inlined_call_operand.vmem [shape: f32[2,128,128], index: 5, kind: input, shape index: {}]   ;;  %s3281_s4 = inlined_call_operand.vmem [shape: f32[1,128], index: 4, kind: input, shape index: {}]   ;;  %s3282_s7 = inlined_call_operand.vmem [shape: f32[2,128,128], index: 7, kind: input, shape index: {}]   ;;  %s3283_s6 = inlined_call_operand.vmem [shape: f32[2,1,128], index: 6, kind: input, shape index: {}]   ;;  %s3284_s8 = inlined_call_operand.vmem [shape: f32[2,1,128], index: 8, kind: input, shape index: {}]   ;;  %s3285_s9 = inlined_call_operand.vmem [shape: f32[128,128], index: 9, kind: input, shape index: {}]   ;;  %s3286_s2 = inlined_call_operand.vmem [shape: bf16[8,128], index: 2, kind: input, shape index: {}]   ;;  %s3287_s11 = inlined_call_operand.vmem [shape: f32[128,128], index: 11, kind: input, shape index: {}]   ;;  %s3288_s10 = inlined_call_operand.vmem [shape: f32[1,128], index: 10, kind: input, shape index: {}]   ;;  %s3289_s12 = inlined_call_operand.vmem [shape: f32[1,128], index: 12, kind: input, shape index: {}]   ;;  %s3290_s13 = inlined_call_operand.vmem [shape: f32[8,128], index: 13, kind: output, shape index: {}]  }
   0x1   :  { %v61_v0 = vld [vmem:[%s3277_s3] sm:$0xff]  ;;  %v62_v1 = vld [vmem:[%s3277_s3 + $0x8] sm:$0xff]  ;;  %v63_v2 = vld [vmem:[%s3277_s3 + $0x10] sm:$0xff] }
   0x2   :  { %v2360_v3 = vpack.c.bf16 %v62_v1, %v61_v0  ;;  %v64_v4 = vld [vmem:[%s3277_s3 + $0x18] sm:$0xff]  ;;  %v65_v6 = vld [vmem:[%s3277_s3 + $0x20] sm:$0xff]  ;;  %v66_v7 = vld [vmem:[%s3277_s3 + $0x28] sm:$0xff] }
   0x3   :  { %v2364_v5 = vpack.c.bf16 %v64_v4, %v63_v2  ;;  %v2368_v8 = vpack.c.bf16 %v66_v7, %v65_v6  ;;  %v45_v9 = vld [vmem:[%s3278_s0] sm:$0xff]  ;;  %v67_v10 = vld [vmem:[%s3277_s3 + $0x30] sm:$0xff]  ;;  %v68_v11 = vld [vmem:[%s3277_s3 + $0x38] sm:$0xff] }
   0x4   :  { %2361 = vmatprep.subr.bf16.mxu0 %v2360_v3  ;;  %1910 = vmatprep.mubr.f32.mxu0 %v45_v9  ;;  %v2372_v12 = vpack.c.bf16 %v68_v11, %v67_v10  ;;  %v69_v13 = vld [vmem:[%s3277_s3 + $0x40] sm:$0xff]  ;;  %v70_v14 = vld [vmem:[%s3277_s3 + $0x48] sm:$0xff]  ;;  %v71_v16 = vld [vmem:[%s3277_s3 + $0x50] sm:$0xff] }
   0x5   :  { %2363 = vmatpush3.bf16.msra.mxu0 %v2360_v3  ;;  %v2376_v15 = vpack.c.bf16 %v70_v14, %v69_v13  ;;  %v72_v17 = vld [vmem:[%s3277_s3 + $0x58] sm:$0xff]  ;;  %v73_v19 = vld [vmem:[%s3277_s3 + $0x60] sm:$0xff]  ;;  %v74_v20 = vld [vmem:[%s3277_s3 + $0x68] sm:$0xff] }
   0x6   :  { %2365 = vmatprep.subr.bf16.mxu0 %v2364_v5  ;;  %v2380_v18 = vpack.c.bf16 %v72_v17, %v71_v16  ;;  %v2384_v21 = vpack.c.bf16 %v74_v20, %v73_v19  ;;  %v75_v22 = vld [vmem:[%s3277_s3 + $0x70] sm:$0xff]  ;;  %v76_v23 = vld [vmem:[%s3277_s3 + $0x78] sm:$0xff]  ;;  %v46_v25 = vld [vmem:[%s3278_s0 + $0x8] sm:$0xff] }
   0x7   :  { %v2388_v24 = vpack.c.bf16 %v76_v23, %v75_v22  ;;  %v47_v26 = vld [vmem:[%s3278_s0 + $0x10] sm:$0xff]  ;;  %v48_v27 = vld [vmem:[%s3278_s0 + $0x18] sm:$0xff]  ;;  %v49_v28 = vld [vmem:[%s3278_s0 + $0x20] sm:$0xff] }
   0x8   :  { %v50_v29 = vld [vmem:[%s3278_s0 + $0x28] sm:$0xff]  ;;  %v51_v30 = vld [vmem:[%s3278_s0 + $0x30] sm:$0xff]  ;;  %v52_v31 = vld [vmem:[%s3278_s0 + $0x38] sm:$0xff] }
   0x9   :  { %2367 = vmatpush3.bf16.msra.mxu0 %v2364_v5  ;;  %v53_v32 = vld [vmem:[%s3278_s0 + $0x40] sm:$0xff]  ;;  %v54_v33 = vld [vmem:[%s3278_s0 + $0x48] sm:$0xff]  ;;  %v55_v34 = vld [vmem:[%s3278_s0 + $0x50] sm:$0xff] }
   0xa   :  { %2369 = vmatprep.subr.bf16.mxu0 %v2368_v8  ;;  %v56_v35 = vld [vmem:[%s3278_s0 + $0x58] sm:$0xff]  ;;  %v57_v36 = vld [vmem:[%s3278_s0 + $0x60] sm:$0xff]  ;;  %v58_v37 = vld [vmem:[%s3278_s0 + $0x68] sm:$0xff] }
   0xb   :  { %v59_v38 = vld [vmem:[%s3278_s0 + $0x70] sm:$0xff]  ;;  %v60_v39 = vld [vmem:[%s3278_s0 + $0x78] sm:$0xff]  ;;  %v2843_v40 = vld [vmem:[%s3279_s1] sm:$0xff]  }
   0xc   :  { %1966 = vmatprep.mubr.bf16.mxu1 %v2843_v40  ;;  %v422_v41 = vld [vmem:[%s3280_s5] sm:$0xff]  ;;  %v423_v42 = vld [vmem:[%s3280_s5 + $0x8] sm:$0xff]  ;;  %v424_v43 = vld [vmem:[%s3280_s5 + $0x10] sm:$0xff] }
   0xd   :  { %2371 = vmatpush3.bf16.msra.mxu0 %v2368_v8  ;;  %v2424_v44 = vpack.c.bf16 %v423_v42, %v422_v41  ;;  %v425_v45 = vld [vmem:[%s3280_s5 + $0x18] sm:$0xff]  ;;  %v426_v47 = vld [vmem:[%s3280_s5 + $0x20] sm:$0xff]  ;;  %v427_v48 = vld [vmem:[%s3280_s5 + $0x28] sm:$0xff] }
   0xe   :  { %2373 = vmatprep.subr.bf16.mxu0 %v2372_v12  ;;  %v2428_v46 = vpack.c.bf16 %v425_v45, %v424_v43  ;;  %v2432_v49 = vpack.c.bf16 %v427_v48, %v426_v47  ;;  %v428_v50 = vld [vmem:[%s3280_s5 + $0x30] sm:$0xff]  ;;  %v429_v51 = vld [vmem:[%s3280_s5 + $0x38] sm:$0xff]  ;;  %v430_v53 = vld [vmem:[%s3280_s5 + $0x40] sm:$0xff] }
   0xf   :  { %v2436_v52 = vpack.c.bf16 %v429_v51, %v428_v50  ;;  %v431_v54 = vld [vmem:[%s3280_s5 + $0x48] sm:$0xff]  ;;  %v432_v56 = vld [vmem:[%s3280_s5 + $0x50] sm:$0xff]  ;;  %v433_v57 = vld [vmem:[%s3280_s5 + $0x58] sm:$0xff] }
  0x10   :  { %v2440_v55 = vpack.c.bf16 %v431_v54, %v430_v53  ;;  %v2444_v58 = vpack.c.bf16 %v433_v57, %v432_v56  ;;  %v434_v59 = vld [vmem:[%s3280_s5 + $0x60] sm:$0xff]  ;;  %v435_v60 = vld [vmem:[%s3280_s5 + $0x68] sm:$0xff]  ;;  %v2899_v41 = vld [vmem:[%s3279_s1 + $0x10] sm:$0xff]  }
  0x11   :  { %2375 = vmatpush3.bf16.msra.mxu0 %v2372_v12  ;;  %v2448_v61 = vpack.c.bf16 %v435_v60, %v434_v59  ;;  %v1570_v62 = vld [vmem:[%s3281_s4] ss:$0 sm:$0xff]  ;;  %v2906_v42 = vld [vmem:[%s3279_s1 + $0x18] sm:$0xff]   ;;  %v2923_v45 = vld [vmem:[%s3279_s1 + $0x30] sm:$0xff]  }
  0x12   :  { %2377 = vmatprep.subr.bf16.mxu0 %v2376_v15  ;;  %v2911_v43 = vld [vmem:[%s3279_s1 + $0x20] sm:$0xff]   ;;  %v436_v47 = vld [vmem:[%s3280_s5 + $0x70] sm:$0xff]  ;;  %v437_v48 = vld [vmem:[%s3280_s5 + $0x78] sm:$0xff] }
  0x13   :  { %v606_v50 = vld [vmem:[%s3282_s7] sm:$0xff]  ;;  %v607_v51 = vld [vmem:[%s3282_s7 + $0x8] sm:$0xff]  ;;  %v609_v54 = vld [vmem:[%s3282_s7 + $0x18] sm:$0xff] }
  0x14   :  { %v2456_v53 = vpack.c.bf16 %v607_v51, %v606_v50  ;;  %v610_v56 = vld [vmem:[%s3282_s7 + $0x20] sm:$0xff]  ;;  %v611_v57 = vld [vmem:[%s3282_s7 + $0x28] sm:$0xff]  ;;  %v612_v59 = vld [vmem:[%s3282_s7 + $0x30] sm:$0xff] }
  0x15   :  { %2379 = vmatpush3.bf16.msra.mxu0 %v2376_v15  ;;  %v613_v60 = vld [vmem:[%s3282_s7 + $0x38] sm:$0xff] }
  0x16   :  { %2381 = vmatprep.subr.bf16.mxu0 %v2380_v18 }
  0x19   :  { %2383 = vmatpush3.bf16.msra.mxu0 %v2380_v18 }
  0x1a   :  { %2385 = vmatprep.subr.bf16.mxu0 %v2384_v21 }
  0x1d   :  { %2387 = vmatpush3.bf16.msra.mxu0 %v2384_v21 }
  0x1e   :  { %2389 = vmatprep.subr.bf16.mxu0 %v2388_v24 }
  0x21   :  { %2391 = vmatpush3.bf16.msra.mxu0 %v2388_v24 }
  0x22   :  { %2425 = vmatprep.subr.bf16.mxu0 %v2424_v44 }
  0x24   :  { %1911 = vmatmul.mubr.f32.vlgmr.msra.gmra.mrb[0].mxu0 %v46_v25 }
  0x25   :  { %1913 = vmatprep.mubr.f32.mxu0 %v47_v26  ;;  %2427 = vmatpush3.bf16.msra.mxu0 %v2424_v44  ;;  %v2918_v44 = vld [vmem:[%s3279_s1 + $0x28] sm:$0xff]  }
  0x26   :  { %2429 = vmatprep.subr.bf16.mxu0 %v2428_v46 }
  0x28   :  { %1914 = vmatmul.mubr.f32.gmra.mrb[2].mxu0 %v48_v27 }
  0x29   :  { %1916 = vmatprep.mubr.f32.mxu0 %v49_v28  ;;  %2431 = vmatpush3.bf16.msra.mxu0 %v2428_v46  ;;  %v2930_v46 = vld [vmem:[%s3279_s1 + $0x38] sm:$0xff]  }
  0x2a   :  { %2433 = vmatprep.subr.bf16.mxu0 %v2432_v49 }
  0x2c   :  { %1917 = vmatmul.mubr.f32.gmra.mrb[4].mxu0 %v50_v29 }
  0x2d   :  { %1919 = vmatprep.mubr.f32.mxu0 %v51_v30  ;;  %2435 = vmatpush3.bf16.msra.mxu0 %v2432_v49  ;;  %v2452_v49 = vpack.c.bf16 %v437_v48, %v436_v47 }
  0x2e   :  { %2437 = vmatprep.subr.bf16.mxu0 %v2436_v52 }
  0x30   :  { %1920 = vmatmul.mubr.f32.gmra.mrb[6].mxu0 %v52_v31 }
  0x31   :  { %1922 = vmatprep.mubr.f32.mxu0 %v53_v32  ;;  %2439 = vmatpush3.bf16.msra.mxu0 %v2436_v52  ;;  %v608_v52 = vld [vmem:[%s3282_s7 + $0x10] sm:$0xff] }
  0x32   :  { %2441 = vmatprep.subr.bf16.mxu0 %v2440_v55 }
  0x34   :  { %1923 = vmatmul.mubr.f32.gmra.mrb[8].mxu0 %v54_v33 }
  0x35   :  { %1925 = vmatprep.mubr.f32.mxu0 %v55_v34  ;;  %2443 = vmatpush3.bf16.msra.mxu0 %v2440_v55  ;;  %v2460_v55 = vpack.c.bf16 %v609_v54, %v608_v52 }
  0x36   :  { %2445 = vmatprep.subr.bf16.mxu0 %v2444_v58 }
  0x38   :  { %1926 = vmatmul.mubr.f32.gmra.mrb[10].mxu0 %v56_v35 }
  0x39   :  { %1928 = vmatprep.mubr.f32.mxu0 %v57_v36  ;;  %2447 = vmatpush3.bf16.msra.mxu0 %v2444_v58  ;;  %v2464_v58 = vpack.c.bf16 %v611_v57, %v610_v56 }
  0x3a   :  { %2449 = vmatprep.subr.bf16.mxu0 %v2448_v61 }
  0x3c   :  { %1929 = vmatmul.mubr.f32.gmra.mrb[12].mxu0 %v58_v37 }
  0x3d   :  { %1931 = vmatprep.mubr.f32.mxu0 %v59_v38  ;;  %2451 = vmatpush3.bf16.msra.mxu0 %v2448_v61  ;;  %v2468_v61 = vpack.c.bf16 %v613_v60, %v612_v59 }
  0x3e   :  { %2453 = vmatprep.subr.bf16.mxu0 %v2452_v49 }
  0x40   :  { %1932 = vmatmul.mubr.f32.gmra.mrb[14].mxu0 %v60_v39  ;;  %v2894_v39 = vld [vmem:[%s3279_s1 + $0x8] sm:$0xff]  }
  0x41   :  { %2455 = vmatpush3.bf16.msra.mxu0 %v2452_v49 }
  0xf7   :  { %v1912_v63 = vpop.f32.mrb[0].mxu0 }
  0xf8   :  { %v156_v0 = vadd.f32 %v1912_v63, %v1570_v62  ;;  %v150_v1 = vpop.f32.mrb[1].mxu0  ;;  %v615_v63 = vld [vmem:[%s3282_s7 + $0x48] sm:$0xff] }
  0xf9   :  { %v151_v2 = vadd.f32 %v1570_v62, %v150_v1  ;;  %v616_v1 = vld [vmem:[%s3282_s7 + $0x50] sm:$0xff] }
  0xfb   :  { %v1915_v3 = vpop.f32.mrb[2].mxu0  ;;  %v2392_v4 = vpack.c.bf16 %v156_v0, %v151_v2  ;;  %v617_v2 = vld [vmem:[%s3282_s7 + $0x58] sm:$0xff] }
  0xfc   :  { %v166_v5 = vadd.f32 %v1915_v3, %v1570_v62  ;;  %v160_v6 = vpop.f32.mrb[3].mxu0  ;;  %v2476_v3 = vpack.c.bf16 %v617_v2, %v616_v1 }
  0xfd   :  { %v161_v7 = vadd.f32 %v1570_v62, %v160_v6  ;;  %2393 = vmatprep.subr.bf16.mxu1 %v2392_v4 }
  0xfe   :  { %2395 = vmatpush3.bf16.msra.mxu1 %v2392_v4  ;;  %v618_v4 = vld [vmem:[%s3282_s7 + $0x60] sm:$0xff] }
  0xff   :  { %v2396_v8 = vpack.c.bf16 %v166_v5, %v161_v7  ;;  %v1918_v9 = vpop.f32.mrb[4].mxu0  ;;  %v619_v5 = vld [vmem:[%s3282_s7 + $0x68] sm:$0xff] }
 0x100   :  { %v176_v10 = vadd.f32 %v1918_v9, %v1570_v62  ;;  %v170_v11 = vpop.f32.mrb[5].mxu0  ;;  %v2480_v6 = vpack.c.bf16 %v619_v5, %v618_v4 }
 0x101   :  { %v171_v12 = vadd.f32 %v1570_v62, %v170_v11  ;;  %2397 = vmatprep.subr.bf16.mxu1 %v2396_v8 }
 0x102   :  { %2399 = vmatpush3.bf16.msra.mxu1 %v2396_v8 }
 0x103   :  { %v2400_v13 = vpack.c.bf16 %v176_v10, %v171_v12  ;;  %v1921_v14 = vpop.f32.mrb[6].mxu0 }
 0x104   :  { %v186_v15 = vadd.f32 %v1921_v14, %v1570_v62  ;;  %v180_v16 = vpop.f32.mrb[7].mxu0 }
 0x105   :  { %v181_v17 = vadd.f32 %v1570_v62, %v180_v16  ;;  %2401 = vmatprep.subr.bf16.mxu1 %v2400_v13 }
 0x106   :  { %2403 = vmatpush3.bf16.msra.mxu1 %v2400_v13 }
 0x107   :  { %v2404_v18 = vpack.c.bf16 %v186_v15, %v181_v17  ;;  %v1924_v19 = vpop.f32.mrb[8].mxu0 }
 0x108   :  { %v196_v20 = vadd.f32 %v1924_v19, %v1570_v62  ;;  %v190_v21 = vpop.f32.mrb[9].mxu0 }
 0x109   :  { %v191_v22 = vadd.f32 %v1570_v62, %v190_v21  ;;  %2405 = vmatprep.subr.bf16.mxu1 %v2404_v18 }
 0x10a   :  { %2407 = vmatpush3.bf16.msra.mxu1 %v2404_v18 }
 0x10b   :  { %v2408_v23 = vpack.c.bf16 %v196_v20, %v191_v22  ;;  %v1927_v24 = vpop.f32.mrb[10].mxu0 }
 0x10c   :  { %v206_v25 = vadd.f32 %v1927_v24, %v1570_v62  ;;  %v200_v26 = vpop.f32.mrb[11].mxu0  ;;  %v621_v24 = vld [vmem:[%s3282_s7 + $0x78] sm:$0xff] }
 0x10d   :  { %v201_v27 = vadd.f32 %v1570_v62, %v200_v26  ;;  %2409 = vmatprep.subr.bf16.mxu1 %v2408_v23  ;;  %v1579_v26 = vld [vmem:[%s3283_s6] ss:$0 sm:$0xff] }
 0x10e   :  { %2411 = vmatpush3.bf16.msra.mxu1 %v2408_v23  ;;  %v620_v23 = vld [vmem:[%s3282_s7 + $0x70] sm:$0xff] }
 0x10f   :  { %v2412_v28 = vpack.c.bf16 %v206_v25, %v201_v27  ;;  %v1930_v29 = vpop.f32.mrb[12].mxu0  ;;  %v2484_v25 = vpack.c.bf16 %v621_v24, %v620_v23  ;;  %v1585_v24 = vld [vmem:[%s3280_s5 + $0xa0] sm:$0xff] }
 0x110   :  { %v216_v30 = vadd.f32 %v1930_v29, %v1570_v62  ;;  %v210_v31 = vpop.f32.mrb[13].mxu0 }
 0x111   :  { %v211_v32 = vadd.f32 %v1570_v62, %v210_v31  ;;  %2413 = vmatprep.subr.bf16.mxu1 %v2412_v28 }
 0x112   :  { %2415 = vmatpush3.bf16.msra.mxu1 %v2412_v28 }
 0x113   :  { %v2416_v33 = vpack.c.bf16 %v216_v30, %v211_v32  ;;  %v1933_v34 = vpop.f32.mrb[14].mxu0 }
 0x114   :  { %v226_v35 = vadd.f32 %v1933_v34, %v1570_v62  ;;  %v220_v36 = vpop.f32.mrb[15].mxu0 }
 0x115   :  { %v221_v37 = vadd.f32 %v1570_v62, %v220_v36  ;;  %2417 = vmatprep.subr.bf16.mxu1 %v2416_v33  ;;  %v614_v62 = vld [vmem:[%s3282_s7 + $0x40] sm:$0xff] }
 0x116   :  { %2419 = vmatpush3.bf16.msra.mxu1 %v2416_v33  ;;  %v2472_v0 = vpack.c.bf16 %v615_v63, %v614_v62 }
 0x117   :  { %v2420_v38 = vpack.c.bf16 %v226_v35, %v221_v37 }
 0x119   :  { %2421 = vmatprep.subr.bf16.mxu1 %v2420_v38 }
 0x11a   :  { %2423 = vmatpush3.bf16.msra.mxu1 %v2420_v38 }
 0x11b   :  { %2457 = vmatprep.subr.bf16.mxu1 %v2456_v53 }
 0x11d   :  { %1967 = vmatmul.mubr.bf16.vlgmr.msra.gmra.mrb[0].mxu1 %v2894_v39 }
 0x11e   :  { %1970 = vmatprep.mubr.bf16.mxu1 %v2899_v41  ;;  %2459 = vmatpush3.bf16.msra.mxu1 %v2456_v53 }
 0x11f   :  { %2461 = vmatprep.subr.bf16.mxu1 %v2460_v55 }
 0x122   :  { %2463 = vmatpush3.bf16.msra.mxu1 %v2460_v55 }
 0x123   :  { %2465 = vmatprep.subr.bf16.mxu1 %v2464_v58 }
 0x125   :  { %1971 = vmatmul.mubr.bf16.gmra.mrb[4].mxu1 %v2906_v42 }
 0x126   :  { %1974 = vmatprep.mubr.bf16.mxu1 %v2911_v43  ;;  %2467 = vmatpush3.bf16.msra.mxu1 %v2464_v58 }
 0x127   :  { %2469 = vmatprep.subr.bf16.mxu1 %v2468_v61 }
 0x12a   :  { %2471 = vmatpush3.bf16.msra.mxu1 %v2468_v61 }
 0x12b   :  { %2473 = vmatprep.subr.bf16.mxu1 %v2472_v0 }
 0x12d   :  { %1975 = vmatmul.mubr.bf16.gmra.mrb[8].mxu1 %v2918_v44 }
 0x12e   :  { %1978 = vmatprep.mubr.bf16.mxu1 %v2923_v45  ;;  %2475 = vmatpush3.bf16.msra.mxu1 %v2472_v0 }
 0x12f   :  { %2477 = vmatprep.subr.bf16.mxu1 %v2476_v3 }
 0x132   :  { %2479 = vmatpush3.bf16.msra.mxu1 %v2476_v3 }
 0x133   :  { %2481 = vmatprep.subr.bf16.mxu1 %v2480_v6 }
 0x135   :  { %1979 = vmatmul.mubr.bf16.gmra.mrb[12].mxu1 %v2930_v46 }
 0x136   :  { %2483 = vmatpush3.bf16.msra.mxu1 %v2480_v6 }
 0x137   :  { %2485 = vmatprep.subr.bf16.mxu1 %v2484_v25 }
 0x13a   :  { %2487 = vmatpush3.bf16.msra.mxu1 %v2484_v25  ;;  %v1586_v25 = vld [vmem:[%s3280_s5 + $0xa8] sm:$0xff] }
 0x1f0   :  { %v1968_v7 = vpop.f32.mrb[0].mxu1 }
 0x1f1   :  { %v359_v8 = vpop.f32.mrb[1].mxu1 }
 0x1f2   :  { %v1969_v9 = vpop.f32.mrb[2].mxu1  ;;  %2014 = vmatprep.mubr.f32.mxu0 %v359_v8 }
 0x1f3   :  { %v362_v10 = vpop.f32.mrb[3].mxu1 }
 0x1f4   :  { %2015 = vmatmul.mubr.f32.vlgmr.msra.gmra.mrb[16].mxu0 %v362_v10 }
 0x1f5   :  { %2017 = vmatprep.mubr.f32.mxu0 %v1968_v7 }
 0x1f8   :  { %v1972_v11 = vpop.f32.mrb[4].mxu1  ;;  %2018 = vmatmul.mubr.f32.gmra.mrb[18].mxu0 %v1969_v9 }
 0x1f9   :  { %v375_v12 = vpop.f32.mrb[5].mxu1 }
 0x1fa   :  { %v1973_v13 = vpop.f32.mrb[6].mxu1  ;;  %2020 = vmatprep.mubr.f32.mxu0 %v375_v12 }
 0x1fb   :  { %v378_v14 = vpop.f32.mrb[7].mxu1 }
 0x1fc   :  { %2021 = vmatmul.mubr.f32.gmra.mrb[20].mxu0 %v378_v14 }
 0x1fd   :  { %2023 = vmatprep.mubr.f32.mxu0 %v1972_v11 }
 0x200   :  { %v1976_v15 = vpop.f32.mrb[8].mxu1  ;;  %2024 = vmatmul.mubr.f32.gmra.mrb[22].mxu0 %v1973_v13 }
 0x201   :  { %v391_v16 = vpop.f32.mrb[9].mxu1 }
 0x202   :  { %v1977_v17 = vpop.f32.mrb[10].mxu1  ;;  %2026 = vmatprep.mubr.f32.mxu0 %v391_v16 }
 0x203   :  { %v394_v18 = vpop.f32.mrb[11].mxu1 }
 0x204   :  { %2027 = vmatmul.mubr.f32.gmra.mrb[24].mxu0 %v394_v18  ;;  %v1581_v18 = vld [vmem:[%s3280_s5 + $0x80] sm:$0xff] }
 0x205   :  { %2029 = vmatprep.mubr.f32.mxu0 %v1976_v15 }
 0x208   :  { %v1980_v19 = vpop.f32.mrb[12].mxu1  ;;  %2030 = vmatmul.mubr.f32.gmra.mrb[26].mxu0 %v1977_v17 }
 0x209   :  { %v407_v20 = vpop.f32.mrb[13].mxu1 }
 0x20a   :  { %v1981_v21 = vpop.f32.mrb[14].mxu1  ;;  %2032 = vmatprep.mubr.f32.mxu0 %v407_v20  ;;  %v1583_v20 = vld [vmem:[%s3280_s5 + $0x90] sm:$0xff] }
 0x20b   :  { %v410_v22 = vpop.f32.mrb[15].mxu1 }
 0x20c   :  { %2033 = vmatmul.mubr.f32.gmra.mrb[28].mxu0 %v410_v22  ;;  %v1584_v22 = vld [vmem:[%s3280_s5 + $0x98] sm:$0xff] }
 0x20d   :  { %2035 = vmatprep.mubr.f32.mxu0 %v1980_v19  ;;  %v1582_v19 = vld [vmem:[%s3280_s5 + $0x88] sm:$0xff]  ;;  %v2524_v23 = vpack.c.bf16 %v1584_v22, %v1583_v20 }
 0x210   :  { %2036 = vmatmul.mubr.f32.gmra.mrb[30].mxu0 %v1981_v21  ;;  %v2520_v21 = vpack.c.bf16 %v1582_v19, %v1581_v18 }
 0x211   :  { %2126 = vmatprep.mubr.bf16.mxu0 %v2843_v40 }
 0x212   :  { %2521 = vmatprep.subr.bf16.mxu1 %v2520_v21 }
 0x2c7   :  { %v2016_v27 = vpop.f32.mrb[16].mxu0 }
 0x2c8   :  { %v517_v28 = vadd.f32 %v2016_v27, %v1579_v26  ;;  %v511_v29 = vpop.f32.mrb[17].mxu0  ;;  %v1587_v27 = vld [vmem:[%s3280_s5 + $0xb0] sm:$0xff] }
 0x2c9   :  { %v512_v30 = vadd.f32 %v1579_v26, %v511_v29 }
 0x2ca   :  { %v591_v32 = vmax.f32 %v517_v28, 0.0  ;;  %v1588_v28 = vld [vmem:[%s3280_s5 + $0xb8] sm:$0xff] }
 0x2cb   :  { %v590_v40 = vmax.f32 %v512_v30, 0.0  ;;  %v2019_v31 = vpop.f32.mrb[18].mxu0  ;;  %v2532_v29 = vpack.c.bf16 %v1588_v28, %v1587_v27  ;;  %v1589_v30 = vld [vmem:[%s3280_s5 + $0xc0] sm:$0xff] }
 0x2cc   :  { %v527_v33 = vadd.f32 %v2019_v31, %v1579_v26  ;;  %v521_v34 = vpop.f32.mrb[19].mxu0 }
 0x2cd   :  { %v522_v35 = vadd.f32 %v1579_v26, %v521_v34  ;;  %2070 = vmatprep.mubr.f32.mxu1 %v590_v40  ;;  %v1590_v40 = vld [vmem:[%s3280_s5 + $0xc8] sm:$0xff] }
 0x2ce   :  { %2071 = vmatmul.mubr.f32.vlgmr.msra.gmra.mrb[16].mxu1 %v591_v32  ;;  %v593_v38 = vmax.f32 %v527_v33, 0.0  ;;  %v2536_v31 = vpack.c.bf16 %v1590_v40, %v1589_v30  ;;  %v1591_v32 = vld [vmem:[%s3280_s5 + $0xd0] sm:$0xff]  ;;  %v1592_v33 = vld [vmem:[%s3280_s5 + $0xd8] sm:$0xff] }
 0x2cf   :  { %v592_v36 = vmax.f32 %v522_v35, 0.0  ;;  %v2022_v37 = vpop.f32.mrb[20].mxu0  ;;  %2523 = vmatpush3.bf16.msra.mxu1 %v2520_v21  ;;  %v2540_v34 = vpack.c.bf16 %v1592_v33, %v1591_v32  ;;  %v1593_v35 = vld [vmem:[%s3280_s5 + $0xe0] sm:$0xff] }
 0x2d0   :  { %v537_v47 = vadd.f32 %v2022_v37, %v1579_v26  ;;  %v531_v48 = vpop.f32.mrb[21].mxu0  ;;  %2525 = vmatprep.subr.bf16.mxu1 %v2524_v23 }
 0x2d1   :  { %v532_v49 = vadd.f32 %v1579_v26, %v531_v48  ;;  %2073 = vmatprep.mubr.f32.mxu1 %v592_v36  ;;  %v1594_v36 = vld [vmem:[%s3280_s5 + $0xe8] sm:$0xff] }
 0x2d2   :  { %2074 = vmatmul.mubr.f32.gmra.mrb[18].mxu1 %v593_v38  ;;  %v595_v52 = vmax.f32 %v537_v47, 0.0  ;;  %v2544_v37 = vpack.c.bf16 %v1594_v36, %v1593_v35  ;;  %v3036_v38 = vld [vmem:[%s3284_s8] ss:$0 sm:$0xff] }
 0x2d3   :  { %v594_v50 = vmax.f32 %v532_v49, 0.0  ;;  %v2025_v51 = vpop.f32.mrb[22].mxu0  ;;  %2527 = vmatpush3.bf16.msra.mxu1 %v2524_v23 }
 0x2d4   :  { %v547_v53 = vadd.f32 %v2025_v51, %v1579_v26  ;;  %v541_v54 = vpop.f32.mrb[23].mxu0 }
 0x2d5   :  { %v542_v55 = vadd.f32 %v1579_v26, %v541_v54  ;;  %2076 = vmatprep.mubr.f32.mxu1 %v594_v50 }
 0x2d6   :  { %2077 = vmatmul.mubr.f32.gmra.mrb[20].mxu1 %v595_v52  ;;  %v597_v58 = vmax.f32 %v547_v53, 0.0 }
 0x2d7   :  { %v596_v56 = vmax.f32 %v542_v55, 0.0  ;;  %v2028_v57 = vpop.f32.mrb[24].mxu0 }
 0x2d8   :  { %v557_v59 = vadd.f32 %v2028_v57, %v1579_v26  ;;  %v551_v60 = vpop.f32.mrb[25].mxu0 }
 0x2d9   :  { %v552_v61 = vadd.f32 %v1579_v26, %v551_v60  ;;  %2079 = vmatprep.mubr.f32.mxu1 %v596_v56 }
 0x2da   :  { %2080 = vmatmul.mubr.f32.gmra.mrb[22].mxu1 %v597_v58  ;;  %v599_v0 = vmax.f32 %v557_v59, 0.0 }
 0x2db   :  { %v598_v62 = vmax.f32 %v552_v61, 0.0  ;;  %v2031_v63 = vpop.f32.mrb[26].mxu0 }
 0x2dc   :  { %v567_v1 = vadd.f32 %v2031_v63, %v1579_v26  ;;  %v561_v2 = vpop.f32.mrb[27].mxu0 }
 0x2dd   :  { %v562_v3 = vadd.f32 %v1579_v26, %v561_v2  ;;  %2082 = vmatprep.mubr.f32.mxu1 %v598_v62 }
 0x2de   :  { %2083 = vmatmul.mubr.f32.gmra.mrb[24].mxu1 %v599_v0  ;;  %v601_v6 = vmax.f32 %v567_v1, 0.0 }
 0x2df   :  { %v600_v4 = vmax.f32 %v562_v3, 0.0  ;;  %v2034_v5 = vpop.f32.mrb[28].mxu0 }
 0x2e0   :  { %v577_v7 = vadd.f32 %v2034_v5, %v1579_v26  ;;  %v571_v8 = vpop.f32.mrb[29].mxu0 }
 0x2e1   :  { %v572_v9 = vadd.f32 %v1579_v26, %v571_v8  ;;  %2085 = vmatprep.mubr.f32.mxu1 %v600_v4 }
 0x2e2   :  { %2086 = vmatmul.mubr.f32.gmra.mrb[26].mxu1 %v601_v6  ;;  %v603_v12 = vmax.f32 %v577_v7, 0.0 }
 0x2e3   :  { %v602_v10 = vmax.f32 %v572_v9, 0.0  ;;  %v2037_v11 = vpop.f32.mrb[30].mxu0 }
 0x2e4   :  { %v587_v13 = vadd.f32 %v2037_v11, %v1579_v26  ;;  %v581_v14 = vpop.f32.mrb[31].mxu0 }
 0x2e5   :  { %v582_v15 = vadd.f32 %v1579_v26, %v581_v14  ;;  %2088 = vmatprep.mubr.f32.mxu1 %v602_v10  ;;  %v2528_v26 = vpack.c.bf16 %v1586_v25, %v1585_v24 }
 0x2e6   :  { %2089 = vmatmul.mubr.f32.gmra.mrb[28].mxu1 %v603_v12  ;;  %v605_v17 = vmax.f32 %v587_v13, 0.0 }
 0x2e7   :  { %v604_v16 = vmax.f32 %v582_v15, 0.0  ;;  %2529 = vmatprep.subr.bf16.mxu1 %v2528_v26 }
 0x2e8   :  { %2531 = vmatpush3.bf16.msra.mxu1 %v2528_v26 }
 0x2e9   :  { %2091 = vmatprep.mubr.f32.mxu1 %v604_v16  ;;  %2533 = vmatprep.subr.bf16.mxu1 %v2532_v29 }
 0x2ea   :  { %2092 = vmatmul.mubr.f32.gmra.mrb[30].mxu1 %v605_v17 }
 0x2ec   :  { %2535 = vmatpush3.bf16.msra.mxu1 %v2532_v29 }
 0x2ed   :  { %2537 = vmatprep.subr.bf16.mxu1 %v2536_v31 }
 0x2f0   :  { %2539 = vmatpush3.bf16.msra.mxu1 %v2536_v31 }
 0x2f1   :  { %2541 = vmatprep.subr.bf16.mxu1 %v2540_v34 }
 0x2f4   :  { %2543 = vmatpush3.bf16.msra.mxu1 %v2540_v34 }
 0x2f5   :  { %2545 = vmatprep.subr.bf16.mxu1 %v2544_v37 }
 0x2f8   :  { %2547 = vmatpush3.bf16.msra.mxu1 %v2544_v37 }
 0x3a1   :  { %v2072_v47 = vpop.f32.mrb[16].mxu1 }
 0x3a2   :  { %v701_v48 = vadd.f32 %v2072_v47, %v3036_v38  ;;  %v695_v49 = vpop.f32.mrb[17].mxu1 }
 0x3a3   :  { %v696_v50 = vadd.f32 %v3036_v38, %v695_v49  ;;  %v1604_v49 = vld [vmem:[%s3282_s7 + $0xa8] sm:$0xff] }
 0x3a4   :  { %v775_v51 = vmax.f32 %v701_v48, 0.0  ;;  %v1603_v48 = vld [vmem:[%s3282_s7 + $0xa0] sm:$0xff] }
 0x3a5   :  { %v774_v52 = vmax.f32 %v696_v50, 0.0  ;;  %v2075_v53 = vpop.f32.mrb[18].mxu1  ;;  %v2560_v50 = vpack.c.bf16 %v1604_v49, %v1603_v48 }
 0x3a6   :  { %v711_v54 = vadd.f32 %v2075_v53, %v3036_v38  ;;  %v705_v55 = vpop.f32.mrb[19].mxu1 }
 0x3a7   :  { %v2488_v56 = vpack.c.bf16 %v775_v51, %v774_v52  ;;  %v706_v57 = vadd.f32 %v3036_v38, %v705_v55  ;;  %v1605_v51 = vld [vmem:[%s3282_s7 + $0xb0] sm:$0xff]  ;;  %v1606_v52 = vld [vmem:[%s3282_s7 + $0xb8] sm:$0xff]  ;;  %v1608_v55 = vld [vmem:[%s3282_s7 + $0xc8] sm:$0xff] }
 0x3a8   :  { %v777_v58 = vmax.f32 %v711_v54, 0.0  ;;  %v2564_v53 = vpack.c.bf16 %v1606_v52, %v1605_v51  ;;  %v1607_v54 = vld [vmem:[%s3282_s7 + $0xc0] sm:$0xff] }
 0x3a9   :  { %v776_v59 = vmax.f32 %v706_v57, 0.0  ;;  %v2078_v60 = vpop.f32.mrb[20].mxu1  ;;  %2489 = vmatprep.subr.bf16.mxu0 %v2488_v56  ;;  %v1609_v57 = vld [vmem:[%s3282_s7 + $0xd0] sm:$0xff] }
 0x3aa   :  { %v721_v61 = vadd.f32 %v2078_v60, %v3036_v38  ;;  %v715_v62 = vpop.f32.mrb[21].mxu1  ;;  %2491 = vmatpush3.bf16.msra.mxu0 %v2488_v56  ;;  %v2568_v56 = vpack.c.bf16 %v1608_v55, %v1607_v54  ;;  %v1611_v60 = vld [vmem:[%s3282_s7 + $0xe0] sm:$0xff] }
 0x3ab   :  { %v2492_v63 = vpack.c.bf16 %v777_v58, %v776_v59  ;;  %v716_v0 = vadd.f32 %v3036_v38, %v715_v62  ;;  %v1610_v58 = vld [vmem:[%s3282_s7 + $0xd8] sm:$0xff] }
 0x3ac   :  { %v779_v1 = vmax.f32 %v721_v61, 0.0  ;;  %v2572_v59 = vpack.c.bf16 %v1610_v58, %v1609_v57  ;;  %v1612_v61 = vld [vmem:[%s3282_s7 + $0xe8] sm:$0xff] }
 0x3ad   :  { %v778_v2 = vmax.f32 %v716_v0, 0.0  ;;  %v2081_v3 = vpop.f32.mrb[22].mxu1  ;;  %2493 = vmatprep.subr.bf16.mxu0 %v2492_v63  ;;  %v2576_v62 = vpack.c.bf16 %v1612_v61, %v1611_v60 }
 0x3ae   :  { %v731_v4 = vadd.f32 %v2081_v3, %v3036_v38  ;;  %v725_v5 = vpop.f32.mrb[23].mxu1  ;;  %2495 = vmatpush3.bf16.msra.mxu0 %v2492_v63 }
 0x3af   :  { %v2496_v6 = vpack.c.bf16 %v779_v1, %v778_v2  ;;  %v726_v7 = vadd.f32 %v3036_v38, %v725_v5 }
 0x3b0   :  { %v781_v8 = vmax.f32 %v731_v4, 0.0 }
 0x3b1   :  { %v780_v9 = vmax.f32 %v726_v7, 0.0  ;;  %v2084_v10 = vpop.f32.mrb[24].mxu1  ;;  %2497 = vmatprep.subr.bf16.mxu0 %v2496_v6 }
 0x3b2   :  { %v741_v11 = vadd.f32 %v2084_v10, %v3036_v38  ;;  %v735_v12 = vpop.f32.mrb[25].mxu1  ;;  %2499 = vmatpush3.bf16.msra.mxu0 %v2496_v6 }
 0x3b3   :  { %v2500_v13 = vpack.c.bf16 %v781_v8, %v780_v9  ;;  %v736_v14 = vadd.f32 %v3036_v38, %v735_v12 }
 0x3b4   :  { %v783_v15 = vmax.f32 %v741_v11, 0.0 }
 0x3b5   :  { %v782_v16 = vmax.f32 %v736_v14, 0.0  ;;  %v2087_v17 = vpop.f32.mrb[26].mxu1  ;;  %2501 = vmatprep.subr.bf16.mxu0 %v2500_v13 }
 0x3b6   :  { %v751_v18 = vadd.f32 %v2087_v17, %v3036_v38  ;;  %v745_v19 = vpop.f32.mrb[27].mxu1  ;;  %2503 = vmatpush3.bf16.msra.mxu0 %v2500_v13 }
 0x3b7   :  { %v2504_v20 = vpack.c.bf16 %v783_v15, %v782_v16  ;;  %v746_v21 = vadd.f32 %v3036_v38, %v745_v19  ;;  %v1613_v15 = vld [vmem:[%s3282_s7 + $0xf0] sm:$0xff]  ;;  %v1614_v16 = vld [vmem:[%s3282_s7 + $0xf8] sm:$0xff] }
 0x3b8   :  { %v785_v22 = vmax.f32 %v751_v18, 0.0  ;;  %v2580_v17 = vpack.c.bf16 %v1614_v16, %v1613_v15  ;;  %v1598_v18 = vld [vmem:[%s3283_s6 + $0x1] ss:$0 sm:$0xff]  ;;  %v1371_v15 = vld [vmem:[%s3285_s9 + $0x38] sm:$0xff] }
 0x3b9   :  { %v784_v23 = vmax.f32 %v746_v21, 0.0  ;;  %v2090_v24 = vpop.f32.mrb[28].mxu1  ;;  %2505 = vmatprep.subr.bf16.mxu0 %v2504_v20 }
 0x3ba   :  { %v761_v25 = vadd.f32 %v2090_v24, %v3036_v38  ;;  %v755_v26 = vpop.f32.mrb[29].mxu1  ;;  %2507 = vmatpush3.bf16.msra.mxu0 %v2504_v20 }
 0x3bb   :  { %v2508_v27 = vpack.c.bf16 %v785_v22, %v784_v23  ;;  %v756_v28 = vadd.f32 %v3036_v38, %v755_v26 }
 0x3bc   :  { %v787_v29 = vmax.f32 %v761_v25, 0.0 }
 0x3bd   :  { %v786_v30 = vmax.f32 %v756_v28, 0.0  ;;  %v2093_v40 = vpop.f32.mrb[30].mxu1  ;;  %2509 = vmatprep.subr.bf16.mxu0 %v2508_v27 }
 0x3be   :  { %v771_v31 = vadd.f32 %v2093_v40, %v3036_v38  ;;  %v765_v32 = vpop.f32.mrb[31].mxu1  ;;  %2511 = vmatpush3.bf16.msra.mxu0 %v2508_v27 }
 0x3bf   :  { %v2512_v33 = vpack.c.bf16 %v787_v29, %v786_v30  ;;  %v766_v34 = vadd.f32 %v3036_v38, %v765_v32  ;;  %v1595_v38 = vld [vmem:[%s3280_s5 + $0xf0] sm:$0xff] }
 0x3c0   :  { %v789_v35 = vmax.f32 %v771_v31, 0.0 }
 0x3c1   :  { %v788_v36 = vmax.f32 %v766_v34, 0.0  ;;  %2513 = vmatprep.subr.bf16.mxu0 %v2512_v33 }
 0x3c2   :  { %2515 = vmatpush3.bf16.msra.mxu0 %v2512_v33 }
 0x3c3   :  { %v2516_v37 = vpack.c.bf16 %v789_v35, %v788_v36 }
 0x3c5   :  { %2517 = vmatprep.subr.bf16.mxu0 %v2516_v37 }
 0x3c6   :  { %2519 = vmatpush3.bf16.msra.mxu0 %v2516_v37 }
 0x3c9   :  { %2127 = vmatmul.mubr.bf16.vlgmr.msra.gmra.mrb[32].mxu0 %v2894_v39  ;;  %v1596_v39 = vld [vmem:[%s3280_s5 + $0xf8] sm:$0xff] }
 0x3ca   :  { %2130 = vmatprep.mubr.bf16.mxu0 %v2899_v41  ;;  %v2548_v47 = vpack.c.bf16 %v1596_v39, %v1595_v38  ;;  %v1599_v41 = vld [vmem:[%s3282_s7 + $0x80] sm:$0xff] }
 0x3cc   :  { %2549 = vmatprep.subr.bf16.mxu1 %v2548_v47 }
 0x3cd   :  { %2551 = vmatpush3.bf16.msra.mxu1 %v2548_v47 }
 0x3d1   :  { %2131 = vmatmul.mubr.bf16.gmra.mrb[36].mxu0 %v2906_v42  ;;  %v1600_v42 = vld [vmem:[%s3282_s7 + $0x88] sm:$0xff] }
 0x3d2   :  { %2134 = vmatprep.mubr.bf16.mxu0 %v2911_v43  ;;  %v1601_v43 = vld [vmem:[%s3282_s7 + $0x90] sm:$0xff] }
 0x3d9   :  { %2135 = vmatmul.mubr.bf16.gmra.mrb[40].mxu0 %v2918_v44  ;;  %v2552_v44 = vpack.c.bf16 %v1600_v42, %v1599_v41 }
 0x3da   :  { %2138 = vmatprep.mubr.bf16.mxu0 %v2923_v45  ;;  %v1602_v45 = vld [vmem:[%s3282_s7 + $0x98] sm:$0xff] }
 0x3db   :  { %2553 = vmatprep.subr.bf16.mxu0 %v2552_v44 }
 0x3dc   :  { %2555 = vmatpush3.bf16.msra.mxu0 %v2552_v44 }
 0x3e1   :  { %2139 = vmatmul.mubr.bf16.gmra.mrb[44].mxu0 %v2930_v46  ;;  %v2556_v46 = vpack.c.bf16 %v1602_v45, %v1601_v43 }
 0x3e3   :  { %2557 = vmatprep.subr.bf16.mxu0 %v2556_v46 }
 0x3e4   :  { %2559 = vmatpush3.bf16.msra.mxu0 %v2556_v46 }
 0x3e5   :  { %2561 = vmatprep.subr.bf16.mxu0 %v2560_v50 }
 0x3e8   :  { %2563 = vmatpush3.bf16.msra.mxu0 %v2560_v50 }
 0x3e9   :  { %2565 = vmatprep.subr.bf16.mxu0 %v2564_v53 }
 0x3ec   :  { %2567 = vmatpush3.bf16.msra.mxu0 %v2564_v53 }
 0x3ed   :  { %2569 = vmatprep.subr.bf16.mxu0 %v2568_v56 }
 0x3f0   :  { %2571 = vmatpush3.bf16.msra.mxu0 %v2568_v56 }
 0x3f1   :  { %2573 = vmatprep.subr.bf16.mxu0 %v2572_v59 }
 0x3f4   :  { %2575 = vmatpush3.bf16.msra.mxu0 %v2572_v59 }
 0x3f5   :  { %2577 = vmatprep.subr.bf16.mxu0 %v2576_v62 }
 0x3f8   :  { %2579 = vmatpush3.bf16.msra.mxu0 %v2576_v62 }
 0x3f9   :  { %2581 = vmatprep.subr.bf16.mxu0 %v2580_v17 }
 0x3fc   :  { %2583 = vmatpush3.bf16.msra.mxu0 %v2580_v17  ;;  %v1372_v17 = vld [vmem:[%s3285_s9 + $0x40] sm:$0xff] }
 0x49c   :  { %v2128_v63 = vpop.f32.mrb[32].mxu0 }
 0x49d   :  { %v856_v0 = vpop.f32.mrb[33].mxu0 }
 0x49e   :  { %v2129_v1 = vpop.f32.mrb[34].mxu0  ;;  %2174 = vmatprep.mubr.f32.mxu1 %v856_v0 }
 0x49f   :  { %v859_v2 = vpop.f32.mrb[35].mxu0 }
 0x4a0   :  { %2175 = vmatmul.mubr.f32.vlgmr.msra.gmra.mrb[32].mxu1 %v859_v2 }
 0x4a1   :  { %2177 = vmatprep.mubr.f32.mxu1 %v2128_v63 }
 0x4a4   :  { %v2132_v3 = vpop.f32.mrb[36].mxu0  ;;  %2178 = vmatmul.mubr.f32.gmra.mrb[34].mxu1 %v2129_v1 }
 0x4a5   :  { %v872_v4 = vpop.f32.mrb[37].mxu0 }
 0x4a6   :  { %v2133_v5 = vpop.f32.mrb[38].mxu0  ;;  %2180 = vmatprep.mubr.f32.mxu1 %v872_v4  ;;  %v2673_v4 = vmov 0.0  }
 0x4a7   :  { %v875_v6 = vpop.f32.mrb[39].mxu0 }
 0x4a8   :  { %2181 = vmatmul.mubr.f32.gmra.mrb[36].mxu1 %v875_v6  ;;  %v1365_v6 = vld [vmem:[%s3285_s9 + $0x8] sm:$0xff] }
 0x4a9   :  { %2183 = vmatprep.mubr.f32.mxu1 %v2132_v3  ;;  %v2671_v3 = vmov 0.0|0.0  }
 0x4aa   :  { %2584 = vmatprep.subr.bf16.mxu1 %v2671_v3  ;;  %2608 = vmatprep.subr.bf16.mxu0 %v2671_v3 }
 0x4ac   :  { %v2136_v7 = vpop.f32.mrb[40].mxu0  ;;  %2184 = vmatmul.mubr.f32.gmra.mrb[38].mxu1 %v2133_v5  ;;  %v1364_v5 = vld [vmem:[%s3285_s9] sm:$0xff] }
 0x4ad   :  { %v888_v8 = vpop.f32.mrb[41].mxu0 }
 0x4ae   :  { %v2137_v9 = vpop.f32.mrb[42].mxu0  ;;  %2186 = vmatprep.mubr.f32.mxu1 %v888_v8  ;;  %v2609_v8 = vpack.c.bf16 %v1365_v6, %v1364_v5 }
 0x4af   :  { %v891_v10 = vpop.f32.mrb[43].mxu0 }
 0x4b0   :  { %2187 = vmatmul.mubr.f32.gmra.mrb[40].mxu1 %v891_v10 }
 0x4b1   :  { %2189 = vmatprep.mubr.f32.mxu1 %v2136_v7  ;;  %v1366_v7 = vld [vmem:[%s3285_s9 + $0x10] sm:$0xff] }
 0x4b4   :  { %v2140_v11 = vpop.f32.mrb[44].mxu0  ;;  %2190 = vmatmul.mubr.f32.gmra.mrb[42].mxu1 %v2137_v9  ;;  %v1367_v9 = vld [vmem:[%s3285_s9 + $0x18] sm:$0xff] }
 0x4b5   :  { %v904_v12 = vpop.f32.mrb[45].mxu0  ;;  %v2612_v10 = vpack.c.bf16 %v1367_v9, %v1366_v7 }
 0x4b6   :  { %v2141_v13 = vpop.f32.mrb[46].mxu0  ;;  %2192 = vmatprep.mubr.f32.mxu1 %v904_v12  ;;  %v1369_v12 = vld [vmem:[%s3285_s9 + $0x28] sm:$0xff] }
 0x4b7   :  { %v907_v14 = vpop.f32.mrb[47].mxu0 }
 0x4b8   :  { %2193 = vmatmul.mubr.f32.gmra.mrb[44].mxu1 %v907_v14  ;;  %v1370_v14 = vld [vmem:[%s3285_s9 + $0x30] sm:$0xff] }
 0x4b9   :  { %2195 = vmatprep.mubr.f32.mxu1 %v2140_v11  ;;  %v1368_v11 = vld [vmem:[%s3285_s9 + $0x20] sm:$0xff]  ;;  %v2618_v16 = vpack.c.bf16 %v1371_v15, %v1370_v14 }
 0x4bc   :  { %2196 = vmatmul.mubr.f32.gmra.mrb[46].mxu1 %v2141_v13  ;;  %v2615_v13 = vpack.c.bf16 %v1369_v12, %v1368_v11 }
 0x4bd   :  { %2286 = vmatprep.mubr.msk.bf16.mxu1 %vm2672_vm0, %v2673_v4 }
 0x573   :  { %v2176_v19 = vpop.f32.mrb[32].mxu1 }
 0x574   :  { %v1016_v20 = vadd.f32 %v2176_v19, %v1598_v18  ;;  %v1010_v21 = vpop.f32.mrb[33].mxu1 }
 0x575   :  { %v1011_v22 = vadd.f32 %v1598_v18, %v1010_v21  ;;  %v1375_v21 = vld [vmem:[%s3285_s9 + $0x58] sm:$0xff] }
 0x576   :  { %v1090_v25 = vmax.f32 %v1016_v20, 0.0  ;;  %v1374_v20 = vld [vmem:[%s3285_s9 + $0x50] sm:$0xff] }
 0x577   :  { %v1089_v23 = vmax.f32 %v1011_v22, 0.0  ;;  %v2179_v24 = vpop.f32.mrb[34].mxu1  ;;  %v2624_v22 = vpack.c.bf16 %v1375_v21, %v1374_v20 }
 0x578   :  { %v1026_v26 = vadd.f32 %v2179_v24, %v1598_v18  ;;  %v1020_v27 = vpop.f32.mrb[35].mxu1  ;;  %v1377_v24 = vld [vmem:[%s3285_s9 + $0x68] sm:$0xff] }
 0x579   :  { %v1021_v28 = vadd.f32 %v1598_v18, %v1020_v27  ;;  %2230 = vmatprep.mubr.f32.mxu0 %v1089_v23  ;;  %v1376_v23 = vld [vmem:[%s3285_s9 + $0x60] sm:$0xff]  ;;  %v1379_v27 = vld [vmem:[%s3285_s9 + $0x78] sm:$0xff] }
 0x57a   :  { %2231 = vmatmul.mubr.f32.vlgmr.msra.gmra.mrb[48].mxu0 %v1090_v25  ;;  %v1092_v40 = vmax.f32 %v1026_v26, 0.0  ;;  %v2627_v25 = vpack.c.bf16 %v1377_v24, %v1376_v23  ;;  %v1378_v26 = vld [vmem:[%s3285_s9 + $0x70] sm:$0xff]  ;;  %v1291_v24 = vld [vmem:[%s3286_s2] sm:$0xf] }
 0x57b   :  { %v1091_v29 = vmax.f32 %v1021_v28, 0.0  ;;  %v2182_v30 = vpop.f32.mrb[36].mxu1  ;;  %2610 = vmatpush3.bf16.msra.mxu0 %v2609_v8  ;;  %v2630_v28 = vpack.c.bf16 %v1379_v27, %v1378_v26  ;;  %v1459_v26 = vld [vmem:[%s3287_s11 + $0x8] sm:$0xff]  ;;  %v1460_v27 = vld [vmem:[%s3287_s11 + $0x10] sm:$0xff] }
 0x57c   :  { %v1036_v31 = vadd.f32 %v2182_v30, %v1598_v18  ;;  %v1030_v32 = vpop.f32.mrb[37].mxu1  ;;  %2611 = vmatprep.subr.bf16.mxu0 %v2671_v3 }
 0x57d   :  { %v1031_v33 = vadd.f32 %v1598_v18, %v1030_v32  ;;  %2233 = vmatprep.mubr.f32.mxu0 %v1091_v29  ;;  %v3182_v29 = vld [vmem:[%s3284_s8 + $0x1] ss:$0 sm:$0xff] }
 0x57e   :  { %2234 = vmatmul.mubr.f32.gmra.mrb[50].mxu0 %v1092_v40  ;;  %v1094_v36 = vmax.f32 %v1036_v31, 0.0 }
 0x57f   :  { %v1093_v34 = vmax.f32 %v1031_v33, 0.0  ;;  %v2185_v35 = vpop.f32.mrb[38].mxu1  ;;  %2613 = vmatpush3.bf16.msra.mxu0 %v2612_v10 }
 0x580   :  { %v1046_v37 = vadd.f32 %v2185_v35, %v1598_v18  ;;  %v1040_v38 = vpop.f32.mrb[39].mxu1  ;;  %2614 = vmatprep.subr.bf16.mxu0 %v2671_v3 }
 0x581   :  { %v1041_v39 = vadd.f32 %v1598_v18, %v1040_v38  ;;  %2236 = vmatprep.mubr.f32.mxu0 %v1093_v34 }
 0x582   :  { %2237 = vmatmul.mubr.f32.gmra.mrb[52].mxu0 %v1094_v36  ;;  %v1096_v42 = vmax.f32 %v1046_v37, 0.0 }
 0x583   :  { %v1095_v47 = vmax.f32 %v1041_v39, 0.0  ;;  %v2188_v41 = vpop.f32.mrb[40].mxu1  ;;  %2616 = vmatpush3.bf16.msra.mxu0 %v2615_v13 }
 0x584   :  { %v1056_v43 = vadd.f32 %v2188_v41, %v1598_v18  ;;  %v1050_v44 = vpop.f32.mrb[41].mxu1  ;;  %2617 = vmatprep.subr.bf16.mxu0 %v2671_v3 }
 0x585   :  { %v1051_v45 = vadd.f32 %v1598_v18, %v1050_v44  ;;  %2239 = vmatprep.mubr.f32.mxu0 %v1095_v47 }
 0x586   :  { %2240 = vmatmul.mubr.f32.gmra.mrb[54].mxu0 %v1096_v42  ;;  %v1098_v49 = vmax.f32 %v1056_v43, 0.0 }
 0x587   :  { %v1097_v46 = vmax.f32 %v1051_v45, 0.0  ;;  %v2191_v48 = vpop.f32.mrb[42].mxu1  ;;  %2619 = vmatpush3.bf16.msra.mxu0 %v2618_v16 }
 0x588   :  { %v1066_v50 = vadd.f32 %v2191_v48, %v1598_v18  ;;  %v1060_v51 = vpop.f32.mrb[43].mxu1  ;;  %2620 = vmatprep.subr.bf16.mxu0 %v2671_v3 }
 0x589   :  { %v1061_v52 = vadd.f32 %v1598_v18, %v1060_v51  ;;  %2242 = vmatprep.mubr.f32.mxu0 %v1097_v46 }
 0x58a   :  { %2243 = vmatmul.mubr.f32.gmra.mrb[56].mxu0 %v1098_v49  ;;  %v1100_v55 = vmax.f32 %v1066_v50, 0.0 }
 0x58b   :  { %v1099_v53 = vmax.f32 %v1061_v52, 0.0  ;;  %v2194_v54 = vpop.f32.mrb[44].mxu1 }
 0x58c   :  { %v1076_v56 = vadd.f32 %v2194_v54, %v1598_v18  ;;  %v1070_v57 = vpop.f32.mrb[45].mxu1 }
 0x58d   :  { %v1071_v58 = vadd.f32 %v1598_v18, %v1070_v57  ;;  %2245 = vmatprep.mubr.f32.mxu0 %v1099_v53 }
 0x58e   :  { %2246 = vmatmul.mubr.f32.gmra.mrb[58].mxu0 %v1100_v55  ;;  %v1102_v61 = vmax.f32 %v1076_v56, 0.0 }
 0x58f   :  { %v1101_v59 = vmax.f32 %v1071_v58, 0.0  ;;  %v2197_v60 = vpop.f32.mrb[46].mxu1 }
 0x590   :  { %v1086_v62 = vadd.f32 %v2197_v60, %v1598_v18  ;;  %v1080_v63 = vpop.f32.mrb[47].mxu1 }
 0x591   :  { %v1081_v0 = vadd.f32 %v1598_v18, %v1080_v63  ;;  %2248 = vmatprep.mubr.f32.mxu0 %v1101_v59  ;;  %v1373_v18 = vld [vmem:[%s3285_s9 + $0x48] sm:$0xff] }
 0x592   :  { %2249 = vmatmul.mubr.f32.gmra.mrb[60].mxu0 %v1102_v61  ;;  %v1104_v2 = vmax.f32 %v1086_v62, 0.0  ;;  %v2621_v19 = vpack.c.bf16 %v1373_v18, %v1372_v17 }
 0x593   :  { %v1103_v1 = vmax.f32 %v1081_v0, 0.0 }
 0x594   :  { %2622 = vmatpush3.bf16.msra.mxu0 %v2621_v19 }
 0x595   :  { %2251 = vmatprep.mubr.f32.mxu0 %v1103_v1  ;;  %2623 = vmatprep.subr.bf16.mxu0 %v2671_v3 }
 0x596   :  { %2252 = vmatmul.mubr.f32.gmra.mrb[62].mxu0 %v1104_v2 }
 0x597   :  { %2322 = vmatprep.mubr.msk.f32.mxu0 %vm2672_vm0, %v2673_v4 }
 0x598   :  { %2625 = vmatpush3.bf16.msra.mxu0 %v2624_v22 }
 0x599   :  { %2626 = vmatprep.subr.bf16.mxu0 %v2671_v3 }
 0x59c   :  { %2628 = vmatpush3.bf16.msra.mxu0 %v2627_v25  ;;  %v1458_v25 = vld [vmem:[%s3287_s11] sm:$0xff] }
 0x59d   :  { %2629 = vmatprep.subr.bf16.mxu0 %v2671_v3 }
 0x5a0   :  { %2631 = vmatpush3.bf16.msra.mxu0 %v2630_v28  ;;  %v2633_v28 = vpack.c.bf16 %v1459_v26, %v1458_v25 }
 0x64d   :  { %v2232_v30 = vpop.f32.mrb[48].mxu0 }
 0x64e   :  { %v1202_v40 = vadd.f32 %v2232_v30, %v3182_v29  ;;  %v1196_v31 = vpop.f32.mrb[49].mxu0 }
 0x64f   :  { %v1197_v32 = vadd.f32 %v3182_v29, %v1196_v31 }
 0x650   :  { %v1276_v33 = vmax.f32 %v1202_v40, 0.0  ;;  %v1463_v40 = vld [vmem:[%s3287_s11 + $0x28] sm:$0xff] }
 0x651   :  { %v1275_v34 = vmax.f32 %v1197_v32, 0.0  ;;  %v2235_v35 = vpop.f32.mrb[50].mxu0  ;;  %v1464_v32 = vld [vmem:[%s3287_s11 + $0x30] sm:$0xff] }
 0x652   :  { %v1212_v36 = vadd.f32 %v2235_v35, %v3182_v29  ;;  %v1206_v37 = vpop.f32.mrb[51].mxu0  ;;  %v1466_v35 = vld [vmem:[%s3287_s11 + $0x40] sm:$0xff] }
 0x653   :  { %v2585_v38 = vpack.c.bf16 %v1276_v33, %v1275_v34  ;;  %v1207_v39 = vadd.f32 %v3182_v29, %v1206_v37  ;;  %v1465_v33 = vld [vmem:[%s3287_s11 + $0x38] sm:$0xff] }
 0x654   :  { %v1278_v47 = vmax.f32 %v1212_v36, 0.0  ;;  %v2642_v34 = vpack.c.bf16 %v1465_v33, %v1464_v32  ;;  %v1467_v36 = vld [vmem:[%s3287_s11 + $0x48] sm:$0xff] }
 0x655   :  { %v1277_v41 = vmax.f32 %v1207_v39, 0.0  ;;  %v2238_v42 = vpop.f32.mrb[52].mxu0  ;;  %2586 = vmatpush3.bf16.msra.mxu1 %v2585_v38  ;;  %v2645_v37 = vpack.c.bf16 %v1467_v36, %v1466_v35  ;;  %v1468_v38 = vld [vmem:[%s3287_s11 + $0x50] sm:$0xff]  ;;  %v1469_v39 = vld [vmem:[%s3287_s11 + $0x58] sm:$0xff] }
 0x656   :  { %v1222_v43 = vadd.f32 %v2238_v42, %v3182_v29  ;;  %v1216_v44 = vpop.f32.mrb[53].mxu0  ;;  %2587 = vmatprep.subr.bf16.mxu1 %v2671_v3  ;;  %v1471_v42 = vld [vmem:[%s3287_s11 + $0x68] sm:$0xff] }
 0x657   :  { %v2588_v45 = vpack.c.bf16 %v1278_v47, %v1277_v41  ;;  %v1217_v46 = vadd.f32 %v3182_v29, %v1216_v44  ;;  %v2648_v47 = vpack.c.bf16 %v1469_v39, %v1468_v38  ;;  %v1470_v41 = vld [vmem:[%s3287_s11 + $0x60] sm:$0xff] }
 0x658   :  { %v1280_v48 = vmax.f32 %v1222_v43, 0.0  ;;  %v2651_v43 = vpack.c.bf16 %v1471_v42, %v1470_v41 }
 0x659   :  { %v1279_v49 = vmax.f32 %v1217_v46, 0.0  ;;  %v2241_v50 = vpop.f32.mrb[54].mxu0  ;;  %2589 = vmatpush3.bf16.msra.mxu1 %v2588_v45 }
 0x65a   :  { %v1232_v51 = vadd.f32 %v2241_v50, %v3182_v29  ;;  %v1226_v52 = vpop.f32.mrb[55].mxu0  ;;  %2590 = vmatprep.subr.bf16.mxu1 %v2671_v3  ;;  %v1473_v50 = vld [vmem:[%s3287_s11 + $0x78] sm:$0xff] }
 0x65b   :  { %v2591_v53 = vpack.c.bf16 %v1280_v48, %v1279_v49  ;;  %v1227_v54 = vadd.f32 %v3182_v29, %v1226_v52  ;;  %v1472_v49 = vld [vmem:[%s3287_s11 + $0x70] sm:$0xff]  ;;  %v1617_v52 = vld [vmem:[%s3288_s10] ss:$0 sm:$0xff] }
 0x65c   :  { %v1282_v55 = vmax.f32 %v1232_v51, 0.0  ;;  %v2654_v51 = vpack.c.bf16 %v1473_v50, %v1472_v49 }
 0x65d   :  { %v1281_v56 = vmax.f32 %v1227_v54, 0.0  ;;  %v2244_v57 = vpop.f32.mrb[56].mxu0  ;;  %2592 = vmatpush3.bf16.msra.mxu1 %v2591_v53 }
 0x65e   :  { %v1242_v58 = vadd.f32 %v2244_v57, %v3182_v29  ;;  %v1236_v59 = vpop.f32.mrb[57].mxu0  ;;  %2593 = vmatprep.subr.bf16.mxu1 %v2671_v3 }
 0x65f   :  { %v2594_v60 = vpack.c.bf16 %v1282_v55, %v1281_v56  ;;  %v1237_v61 = vadd.f32 %v3182_v29, %v1236_v59  ;;  %v1551_v56 = vlaneseq }
 0x660   :  { %v1284_v62 = vmax.f32 %v1242_v58, 0.0  ;;  %v1618_v58 = vld [vmem:[%s3289_s12] ss:$0 sm:$0xff] }
 0x661   :  { %v1283_v63 = vmax.f32 %v1237_v61, 0.0  ;;  %v2247_v0 = vpop.f32.mrb[58].mxu0  ;;  %2595 = vmatpush3.bf16.msra.mxu1 %v2594_v60  ;;  %v1552_v57 = vand.u32 127, %v1551_v56 }
 0x662   :  { %v1252_v1 = vadd.f32 %v2247_v0, %v3182_v29  ;;  %v1246_v2 = vpop.f32.mrb[59].mxu0  ;;  %2596 = vmatprep.subr.bf16.mxu1 %v2671_v3 }
 0x663   :  { %v2597_v5 = vpack.c.bf16 %v1284_v62, %v1283_v63  ;;  %v1247_v6 = vadd.f32 %v3182_v29, %v1246_v2  ;;  %vm1553_vm1 = vcmp.lt.s32.totalorder %v1552_v57, 8 }
 0x664   :  { %v1286_v7 = vmax.f32 %v1252_v1, 0.0 }
 0x665   :  { %v1285_v8 = vmax.f32 %v1247_v6, 0.0  ;;  %v2250_v9 = vpop.f32.mrb[60].mxu0  ;;  %2598 = vmatpush3.bf16.msra.mxu1 %v2597_v5 }
 0x666   :  { %v1262_v10 = vadd.f32 %v2250_v9, %v3182_v29  ;;  %v1256_v11 = vpop.f32.mrb[61].mxu0  ;;  %2599 = vmatprep.subr.bf16.mxu1 %v2671_v3 }
 0x667   :  { %v2600_v12 = vpack.c.bf16 %v1286_v7, %v1285_v8  ;;  %v1257_v13 = vadd.f32 %v3182_v29, %v1256_v11 }
 0x668   :  { %v1288_v14 = vmax.f32 %v1262_v10, 0.0 }
 0x669   :  { %v1287_v15 = vmax.f32 %v1257_v13, 0.0  ;;  %v2253_v16 = vpop.f32.mrb[62].mxu0  ;;  %2601 = vmatpush3.bf16.msra.mxu1 %v2600_v12 }
 0x66a   :  { %v1272_v17 = vadd.f32 %v2253_v16, %v3182_v29  ;;  %v1266_v18 = vpop.f32.mrb[63].mxu0  ;;  %2602 = vmatprep.subr.bf16.mxu1 %v2671_v3 }
 0x66b   :  { %v2603_v19 = vpack.c.bf16 %v1288_v14, %v1287_v15  ;;  %v1267_v20 = vadd.f32 %v3182_v29, %v1266_v18  ;;  %v1461_v29 = vld [vmem:[%s3287_s11 + $0x18] sm:$0xff] }
 0x66c   :  { %v1290_v21 = vmax.f32 %v1272_v17, 0.0  ;;  %v2636_v30 = vpack.c.bf16 %v1461_v29, %v1460_v27 }
 0x66d   :  { %v1289_v22 = vmax.f32 %v1267_v20, 0.0  ;;  %2604 = vmatpush3.bf16.msra.mxu1 %v2603_v19 }
 0x66e   :  { %2605 = vmatprep.subr.bf16.mxu1 %v2671_v3 }
 0x66f   :  { %v2606_v23 = vpack.c.bf16 %v1290_v21, %v1289_v22 }
 0x671   :  { %2607 = vmatpush3.bf16.msra.mxu1 %v2606_v23 }
 0x672   :  { %2632 = vmatprep.subr.bf16.mxu1 %v2671_v3 }
 0x674   :  { %2287 = vmatmul.mubr.bf16.vlgmr.msra.gmra.mrb[48].mxu1 %v1291_v24 }
 0x675   :  { %2357 = vmatprep.mubr.msk.f32.mxu1 %vm2672_vm0, %v2673_v4  ;;  %2634 = vmatpush3.bf16.msra.mxu1 %v2633_v28  ;;  %v1462_v4 = vld [vmem:[%s3287_s11 + $0x20] sm:$0xff] }
 0x676   :  { %2635 = vmatprep.subr.bf16.mxu1 %v2671_v3  ;;  %v2639_v31 = vpack.c.bf16 %v1463_v40, %v1462_v4 }
 0x679   :  { %2637 = vmatpush3.bf16.msra.mxu1 %v2636_v30 }
 0x67a   :  { %2638 = vmatprep.subr.bf16.mxu1 %v2671_v3 }
 0x67d   :  { %2640 = vmatpush3.bf16.msra.mxu1 %v2639_v31 }
 0x67e   :  { %2641 = vmatprep.subr.bf16.mxu1 %v2671_v3 }
 0x681   :  { %2643 = vmatpush3.bf16.msra.mxu1 %v2642_v34 }
 0x682   :  { %2644 = vmatprep.subr.bf16.mxu1 %v2671_v3 }
 0x685   :  { %2646 = vmatpush3.bf16.msra.mxu1 %v2645_v37 }
 0x686   :  { %2647 = vmatprep.subr.bf16.mxu1 %v2671_v3 }
 0x689   :  { %2649 = vmatpush3.bf16.msra.mxu1 %v2648_v47 }
 0x68a   :  { %2650 = vmatprep.subr.bf16.mxu1 %v2671_v3 }
 0x68d   :  { %2652 = vmatpush3.bf16.msra.mxu1 %v2651_v43 }
 0x68e   :  { %2653 = vmatprep.subr.bf16.mxu1 %v2671_v3 }
 0x691   :  { %2655 = vmatpush3.bf16.msra.mxu1 %v2654_v51 }
 0x747   :  { %v1358_v44 = vpop.f32.mrb[48].mxu1 }
 0x748   :  { %v2288_v45 = vpop.f32.mrb[49].mxu1  ;;  %2323 = vmatmul.mubr.f32.vlgmr.msra.gmra.mrb[64].mxu0 %v1358_v44 }
 0x749   :  { %v1361_v46 = vpop.f32.mrb[50].mxu1 }
 0x74a   :  { %v2289_v48 = vpop.f32.mrb[51].mxu1 }
 0x81b   :  { %v1453_v3 = vpop.f32.mrb[64].mxu0 }
 0x81c   :  { %v1454_v53 = vadd.f32 %v1617_v52, %v1453_v3  ;;  %v2324_v54 = vpop.f32.mrb[65].mxu0 }
 0x81e   :  { %v1457_v55 = vmax.f32 %v1454_v53, 0.0 }
 0x820   :  { %2358 = vmatmul.mubr.f32.vlgmr.msra.gmra.mrb[52].mxu1 %v1457_v55 }
 0x8f3   :  { %v1547_v59 = vpop.f32.mrb[52].mxu1 }
 0x8f4   :  { %v1548_v60 = vadd.f32 %v1618_v58, %v1547_v59  ;;  %v2359_v61 = vpop.f32.mrb[53].mxu1 }
 0x8f6   :  { %v1554_v62 = vsel %vm1553_vm1, %v1548_v60, -1e+30 }
 0x8f7   :  { %1555 = vmax.xlane.f32.xlu0 %v1554_v62 }
 0x984   :  { %v1556_v63 = vpop.xlane.xlu0 %1555 }
 0x985   :  { %v1557_v0 = vsub.f32 %v1554_v62, %v1556_v63 }
 0x987   :  { %v1558_v1 = vmul.f32 1.442695, %v1557_v0 }
 0x989   :  { %2667 = vpow2.f32 %v1558_v1 }
 0x993   :  { %v2668_v2 = vpop.eup %2667 }
 0x994   :  { %1560 = vadd.xlane.f32.xlu0 %v2668_v2 }
 0xa21   :  { %v1561_v5 = vpop.xlane.xlu0 %1560 }
 0xa22   :  { %2669 = vlog2.f32 %v1561_v5 }
 0xa2c   :  { %v2670_v6 = vpop.eup %2669 }
 0xa2d   :  { %v1563_v7 = vmul.f32 0.6931472, %v2670_v6 }
 0xa2f   :  { %v1564_v8 = vsub.f32 %v1557_v0, %v1563_v7 }
 0xa31   :  { %1565 = vst [vmem:[%s3290_s13] sm:$0xff] %v1564_v8 }

</bundles_post_ra>
